<compile_context>
chip_gen: v7x
topology: tpu7x:2x2x1
jax: 0.10.0
libtpu: 0.0.40
codegen_flags: <defaults>
</compile_context>

<pallas_src>
import functools
import math

import jax
import jax.numpy as jnp
from jax.experimental import pallas as pl
from jax.experimental.pallas import tpu as pltpu

EPS = 1e-6


def _layernorm(v, a, b, eps=EPS):
    # Matches the reference LayerNorm: Bessel-corrected std, divisor (std+eps).
    # Exact divide (not approx reciprocal) per the accuracy review note.
    n = v.shape[-1]
    mean = jnp.mean(v, axis=-1, keepdims=True)
    var = jnp.sum((v - mean) ** 2, axis=-1, keepdims=True) * (1.0 / (n - 1))
    std = jnp.sqrt(var)
    return a * (v - mean) / (std + eps) + b


def encoder_stack_kernel(x_ref, wqkv_ref, wo_ref, w1_ref, w2_ref,
                         ln1_a_ref, ln1_b_ref, ln2_a_ref, ln2_b_ref,
                         norm_a_ref, norm_b_ref,
                         o_ref,
                         h_scratch,
                         *, n_heads, B, S, D):
    l = pl.program_id(0)
    n_layers = pl.num_programs(0)
    hd = D // n_heads
    bf16 = jnp.bfloat16

    # Load the input once; activations then live in VMEM across all layers.
    @pl.when(l == 0)
    def _():
        h_scratch[...] = x_ref[...].reshape(B * S, D)

    x = h_scratch[...]                                    # (B*S, D) f32

    # ---------------- attention block (pre-norm; residual uses normed x) ----
    xn = _layernorm(x, ln1_a_ref[0], ln1_b_ref[0])        # (B*S, D) f32

    # Fused QKV projection: one MXU push with N = 3D, bf16 in / f32 accumulate.
    # 1/sqrt(hd) has been folded into the Q columns of wqkv at pack time.
    qkv = jnp.dot(xn.astype(bf16), wqkv_ref[0],
                  preferred_element_type=jnp.float32)     # (B*S, 3D) f32
    qkv = qkv.astype(bf16)                                # bf16 operands for attention MXU
    q = qkv[:, :D].reshape(B, S, D)
    k = qkv[:, D:2 * D].reshape(B, S, D)
    v = qkv[:, 2 * D:].reshape(B, S, D)

    # Per-head attention, batched over B with 3-D einsums (flash-attention
    # style).  Head outputs are folded straight into the output projection
    # via wo packed as (H, hd, D): no concatenated head slab, no lane-narrow
    # scratch stores.  Short static unroll; see TODO above for large H.
    attn = jnp.zeros((B * S, D), jnp.float32)
    for h_idx in range(n_heads):
        sl = slice(h_idx * hd, (h_idx + 1) * hd)
        scores = jnp.einsum('bqd,bkd->bqk', q[:, :, sl], k[:, :, sl],
                            preferred_element_type=jnp.float32)   # (B,S,S) f32
        m = jnp.max(scores, axis=-1, keepdims=True)
        p = jnp.exp(scores - m)
        p = p * pl.reciprocal(jnp.sum(p, axis=-1, keepdims=True), approx=True)
        oh = jnp.einsum('bqk,bkd->bqd', p.astype(bf16), v[:, :, sl],
                        preferred_element_type=jnp.float32)       # (B,S,hd)
        attn = attn + jnp.dot(oh.reshape(B * S, hd).astype(bf16),
                              wo_ref[0, h_idx],
                              preferred_element_type=jnp.float32)

    h = xn + attn                                         # residual on normed x

    # ---------------- feed-forward block ------------------------------------
    hn = _layernorm(h, ln2_a_ref[0], ln2_b_ref[0])
    ff = jnp.maximum(jnp.dot(hn.astype(bf16), w1_ref[0],
                             preferred_element_type=jnp.float32), 0.0)
    ff = jnp.dot(ff.astype(bf16), w2_ref[0],
                 preferred_element_type=jnp.float32)

    out = h + ff
    h_scratch[...] = out

    # Fused final LayerNorm; output written back to HBM only once.
    @pl.when(l == n_layers - 1)
    def _():
        y = _layernorm(out, norm_a_ref[...], norm_b_ref[...])
        o_ref[...] = y.reshape(B, S, D)


def encoder_forward(x, kparams, n_heads):
    B, S, D = x.shape
    L = kparams["wqkv"].shape[0]
    hd = D // n_heads

    xspec = pl.BlockSpec((B, S, D), lambda l: (0, 0, 0))        # resident
    w3spec = pl.BlockSpec((1, D, 3 * D), lambda l: (l, 0, 0))   # streamed per layer
    wospec = pl.BlockSpec((1, n_heads, hd, D), lambda l: (l, 0, 0, 0))
    wspec = pl.BlockSpec((1, D, D), lambda l: (l, 0, 0))
    lnspec = pl.BlockSpec((1, 1, D), lambda l: (l, 0, 0))
    nspec = pl.BlockSpec((1, D), lambda l: (0, 0))

    kernel = functools.partial(encoder_stack_kernel,
                               n_heads=n_heads, B=B, S=S, D=D)

    return pl.pallas_call(
        kernel,
        out_shape=jax.ShapeDtypeStruct((B, S, D), jnp.float32),
        grid=(L,),
        in_specs=[xspec, w3spec, wospec, wspec, wspec,
                  lnspec, lnspec, lnspec, lnspec, nspec, nspec],
        out_specs=xspec,
        scratch_shapes=[pltpu.VMEM((B * S, D), jnp.float32)],   # resident activations
        compiler_params=pltpu.CompilerParams(
            # Sequential dependency across layers -> "arbitrary".
            dimension_semantics=("arbitrary",),
            # 32 MiB fits every generation at this scale; for large D raise
            # toward ~96 MiB (v5e/v6e) or K/N-tile + ~48-56 MiB (v7x).
            vmem_limit_bytes=32 * 1024 * 1024,
        ),
    )(x, kparams["wqkv"], kparams["wo"], kparams["w1"], kparams["w2"],
      kparams["ln1_a"], kparams["ln1_b"], kparams["ln2_a"], kparams["ln2_b"],
      kparams["norm_a"], kparams["norm_b"])


# ----------------------- pure-JAX reference (for checking) -----------------------
def _layernorm_ref(x, a, b, eps=EPS):
    n = x.shape[-1]
    mean = jnp.mean(x, axis=-1, keepdims=True)
    var = jnp.sum((x - mean) ** 2, axis=-1, keepdims=True) / (n - 1)
    return a * (x - mean) / (jnp.sqrt(var) + eps) + b


def encoder_forward_ref(x, params, n_heads):
    B, S, D = x.shape
    hd = D // n_heads
    for layer in params["layers"]:
        xn = _layernorm_ref(x, layer["ln1_a"][0], layer["ln1_b"][0])
        q = xn @ layer["wq"]
        k = xn @ layer["wk"]
        v = xn @ layer["wv"]
        qh = q.reshape(B, S, n_heads, hd).transpose(0, 2, 1, 3)
        kh = k.reshape(B, S, n_heads, hd).transpose(0, 2, 1, 3)
        vh = v.reshape(B, S, n_heads, hd).transpose(0, 2, 1, 3)
        scores = jnp.einsum("bhqd,bhkd->bhqk", qh, kh) / math.sqrt(hd)
        p = jax.nn.softmax(scores, axis=-1)
        attn = jnp.einsum("bhqk,bhkd->bhqd", p, vh)
        attn = attn.transpose(0, 2, 1, 3).reshape(B, S, D) @ layer["wo"]
        h = xn + attn
        hn = _layernorm_ref(h, layer["ln2_a"][0], layer["ln2_b"][0])
        x = h + jnp.maximum(hn @ layer["w1"], 0.0) @ layer["w2"]
    return _layernorm_ref(x, params["norm_a"][0], params["norm_b"][0])


# ----------------------------- parameter init / packing -----------------------------
def init_params(key, n_layer, d):
    # Canonical f32 params.  Weights stored (in, out) so forward is x @ W
    # (equivalent to torch Linear's x @ W.T with W of shape (out, in)).
    scale = 1.0 / math.sqrt(d)
    layers = []
    for _ in range(n_layer):
        keys = jax.random.split(key, 7)
        key = keys[0]
        layer = {
            "wq": jax.random.normal(keys[1], (d, d), jnp.float32) * scale,
            "wk": jax.random.normal(keys[2], (d, d), jnp.float32) * scale,
            "wv": jax.random.normal(keys[3], (d, d), jnp.float32) * scale,
            "wo": jax.random.normal(keys[4], (d, d), jnp.float32) * scale,
            "w1": jax.random.normal(keys[5], (d, d), jnp.float32) * scale,
            "w2": jax.random.normal(keys[6], (d, d), jnp.float32) * scale,
            "ln1_a": jnp.ones((1, d), jnp.float32),
            "ln1_b": jnp.zeros((1, d), jnp.float32),
            "ln2_a": jnp.ones((1, d), jnp.float32),
            "ln2_b": jnp.zeros((1, d), jnp.float32),
        }
        layers.append(layer)
    return {
        "layers": layers,
        "norm_a": jnp.ones((1, d), jnp.float32),
        "norm_b": jnp.zeros((1, d), jnp.float32),
    }


def pack_params(params, n_heads):
    """Stack per-layer weights along a leading L axis, fuse QKV (with the
    1/sqrt(head_dim) score scale folded into the Q columns), reshape wo to
    (H, hd, D) for per-head output-projection accumulation, and cast matmul
    weights to bf16 (f32 accumulation happens inside the kernel)."""
    layers = params["layers"]
    bf16 = jnp.bfloat16
    d = layers[0]["wq"].shape[0]
    hd = d // n_heads
    inv_sqrt_hd = 1.0 / math.sqrt(hd)
    wqkv = jnp.stack([jnp.concatenate(
        [l["wq"] * inv_sqrt_hd, l["wk"], l["wv"]], axis=1)
        for l in layers]).astype(bf16)                            # (L, D, 3D)
    wo = jnp.stack([l["wo"].reshape(n_heads, hd, d)
                    for l in layers]).astype(bf16)                # (L, H, hd, D)
    return {
        "wqkv": wqkv,
        "wo": wo,
        "w1": jnp.stack([l["w1"] for l in layers]).astype(bf16),  # (L, D, D)
        "w2": jnp.stack([l["w2"] for l in layers]).astype(bf16),
        "ln1_a": jnp.stack([l["ln1_a"] for l in layers]),         # (L, 1, D) f32
        "ln1_b": jnp.stack([l["ln1_b"] for l in layers]),
        "ln2_a": jnp.stack([l["ln2_a"] for l in layers]),
        "ln2_b": jnp.stack([l["ln2_b"] for l in layers]),
        "norm_a": params["norm_a"],                               # (1, D) f32
        "norm_b": params["norm_b"],
    }


if __name__ == "__main__":
    # Small ModelArgs-consistent config: n_embd == dim (required by the
    # residual connections), n_heads divides dim, dropout = 0.0.
    # (For real perf, size B*S to >=128/256 and D/hd to multiples of 128.)
    B, S, D, H, L = 2, 8, 32, 4, 2

    key = jax.random.PRNGKey(0)
    k_x, k_p = jax.random.split(key)
    x = jax.random.normal(k_x, (B, S, D), jnp.float32)
    params = init_params(k_p, n_layer=L, d=D)
    kparams = pack_params(params, n_heads=H)

    out = jax.block_until_ready(encoder_forward(x, kparams, n_heads=H))
    ref = jax.block_until_ready(encoder_forward_ref(x, params, n_heads=H))

    assert out.shape == (B, S, D)
    # bf16 matmul inputs + approx softmax reciprocal vs exact f32 reference.
    assert jnp.allclose(out, ref, rtol=5e-2, atol=5e-2), (
        float(jnp.max(jnp.abs(out - ref))))

    print("KERNEL_OK")
</pallas_src>

<mosaic_0001>
module attributes {stable_mosaic.version = 11 : i64} {
  func.func @encoder_stack_kernel(%arg0: i32, %arg1: memref<2x8x32xf32, #tpu.memory_space<vmem>>, %arg2: memref<1x32x96xbf16, #tpu.memory_space<vmem>>, %arg3: memref<1x4x8x32xbf16, #tpu.memory_space<vmem>>, %arg4: memref<1x32x32xbf16, #tpu.memory_space<vmem>>, %arg5: memref<1x32x32xbf16, #tpu.memory_space<vmem>>, %arg6: memref<1x1x32xf32, #tpu.memory_space<vmem>>, %arg7: memref<1x1x32xf32, #tpu.memory_space<vmem>>, %arg8: memref<1x1x32xf32, #tpu.memory_space<vmem>>, %arg9: memref<1x1x32xf32, #tpu.memory_space<vmem>>, %arg10: memref<1x32xf32, #tpu.memory_space<vmem>>, %arg11: memref<1x32xf32, #tpu.memory_space<vmem>>, %arg12: memref<2x8x32xf32, #tpu.memory_space<vmem>>, %arg13: memref<16x32xf32, #tpu.memory_space<vmem>>) attributes {dimension_semantics = [#tpu.dimension_semantics<arbitrary>], iteration_bounds = array<i64: 2>, scalar_prefetch = 0 : i64, scratch_operands = 1 : i64, tpu.core_type = #tpu.core_type<tc>, window_params = [{pipeline_mode = #tpu.pipeline_mode<synchronous>, transform_indices = @transform_0, window_bounds = array<i64: 2, 8, 32>}, {transform_indices = @transform_1, window_bounds = array<i64: 1, 32, 96>}, {transform_indices = @transform_2, window_bounds = array<i64: 1, 4, 8, 32>}, {transform_indices = @transform_3, window_bounds = array<i64: 1, 32, 32>}, {transform_indices = @transform_4, window_bounds = array<i64: 1, 32, 32>}, {transform_indices = @transform_5, window_bounds = array<i64: 1, 1, 32>}, {transform_indices = @transform_6, window_bounds = array<i64: 1, 1, 32>}, {transform_indices = @transform_7, window_bounds = array<i64: 1, 1, 32>}, {transform_indices = @transform_8, window_bounds = array<i64: 1, 1, 32>}, {pipeline_mode = #tpu.pipeline_mode<synchronous>, transform_indices = @transform_9, window_bounds = array<i64: 1, 32>}, {pipeline_mode = #tpu.pipeline_mode<synchronous>, transform_indices = @transform_10, window_bounds = array<i64: 1, 32>}, {pipeline_mode = #tpu.pipeline_mode<synchronous>, transform_indices = @transform_11, window_bounds = array<i64: 2, 8, 32>}]} {
    %c0_i32 = arith.constant 0 : i32
    %0 = arith.cmpi eq, %arg0, %c0_i32 : i32
    %1 = arith.extui %0 : i1 to i32
    %c0_i32_0 = arith.constant 0 : i32
    %2 = arith.cmpi ne, %1, %c0_i32_0 : i32
    scf.if %2 {
      %c0_73 = arith.constant 0 : index
      %c0_74 = arith.constant 0 : index
      %c0_75 = arith.constant 0 : index
      %172 = vector.load %arg1[%c0_73, %c0_74, %c0_75] : memref<2x8x32xf32, #tpu.memory_space<vmem>>, vector<2x8x32xf32>
      %173 = vector.shape_cast %172 : vector<2x8x32xf32> to vector<16x32xf32>
      %c0_76 = arith.constant 0 : index
      %c0_77 = arith.constant 0 : index
      %174 = vector.load %arg13[%c0_76, %c0_77] : memref<16x32xf32, #tpu.memory_space<vmem>>, vector<16x32xf32>
      tpu.vector_store %arg13[%c0_76, %c0_77], %173 {strides = array<i32>} : memref<16x32xf32, #tpu.memory_space<vmem>>, vector<16x32xf32>,
    } else {
    }
    %c0 = arith.constant 0 : index
    %c0_1 = arith.constant 0 : index
    %3 = vector.load %arg13[%c0, %c0_1] : memref<16x32xf32, #tpu.memory_space<vmem>>, vector<16x32xf32>
    %c0_2 = arith.constant 0 : index
    %c0_3 = arith.constant 0 : index
    %c0_4 = arith.constant 0 : index
    %4 = vector.load %arg6[%c0_2, %c0_3, %c0_4] : memref<1x1x32xf32, #tpu.memory_space<vmem>>, vector<1x1x32xf32>
    %5 = vector.shape_cast %4 : vector<1x1x32xf32> to vector<1x32xf32>
    %c0_5 = arith.constant 0 : index
    %c0_6 = arith.constant 0 : index
    %c0_7 = arith.constant 0 : index
    %6 = vector.load %arg7[%c0_5, %c0_6, %c0_7] : memref<1x1x32xf32, #tpu.memory_space<vmem>>, vector<1x1x32xf32>
    %7 = vector.shape_cast %6 : vector<1x1x32xf32> to vector<1x32xf32>
    %cst = arith.constant dense<0.000000e+00> : vector<16xf32>
    %8 = vector.multi_reduction <add>, %3, %cst [1] : vector<16x32xf32> to vector<16xf32>
    %9 = vector.shape_cast %8 : vector<16xf32> to vector<16x1xf32>
    %cst_8 = arith.constant 3.200000e+01 : f32
    %10 = vector.broadcast %cst_8 : f32 to vector<16x1xf32>
    %11 = arith.divf %9, %10 : vector<16x1xf32>
    %12 = vector.broadcast %11 : vector<16x1xf32> to vector<16x32xf32>
    %13 = arith.subf %3, %12 : vector<16x32xf32>
    %14 = arith.mulf %13, %13 : vector<16x32xf32>
    %cst_9 = arith.constant dense<0.000000e+00> : vector<16xf32>
    %15 = vector.multi_reduction <add>, %14, %cst_9 [1] : vector<16x32xf32> to vector<16xf32>
    %16 = vector.shape_cast %15 : vector<16xf32> to vector<16x1xf32>
    %cst_10 = arith.constant 0.0322580636 : f32
    %17 = vector.broadcast %cst_10 : f32 to vector<16x1xf32>
    %18 = arith.mulf %16, %17 : vector<16x1xf32>
    %19 = math.sqrt %18 : vector<16x1xf32>
    %20 = vector.broadcast %11 : vector<16x1xf32> to vector<16x32xf32>
    %21 = arith.subf %3, %20 : vector<16x32xf32>
    %22 = vector.broadcast %5 : vector<1x32xf32> to vector<16x32xf32>
    %23 = arith.mulf %22, %21 : vector<16x32xf32>
    %cst_11 = arith.constant 9.99999997E-7 : f32
    %24 = vector.broadcast %cst_11 : f32 to vector<16x1xf32>
    %25 = arith.addf %19, %24 : vector<16x1xf32>
    %26 = vector.broadcast %25 : vector<16x1xf32> to vector<16x32xf32>
    %27 = arith.divf %23, %26 : vector<16x32xf32>
    %28 = vector.broadcast %7 : vector<1x32xf32> to vector<16x32xf32>
    %29 = arith.addf %27, %28 : vector<16x32xf32>
    %30 = arith.truncf %29 : vector<16x32xf32> to vector<16x32xbf16>
    %c0_12 = arith.constant 0 : index
    %c0_13 = arith.constant 0 : index
    %c0_14 = arith.constant 0 : index
    %31 = vector.load %arg2[%c0_12, %c0_13, %c0_14] : memref<1x32x96xbf16, #tpu.memory_space<vmem>>, vector<1x32x96xbf16>
    %32 = vector.shape_cast %31 : vector<1x32x96xbf16> to vector<32x96xbf16>
    %cst_15 = arith.constant dense<0.000000e+00> : vector<16x96xf32>
    %33 = tpu.matmul %30, %32, %cst_15 {dimension_numbers = #tpu.dot_dimension_numbers<[1], [0], [0], [1], [0, 0, 1, 1], [], []>} : vector<16x32xbf16>, vector<32x96xbf16>, vector<16x96xf32> -> vector<16x96xf32>
    %34 = arith.truncf %33 : vector<16x96xf32> to vector<16x96xbf16>
    %35 = vector.extract_strided_slice %34 {offsets = [0, 0], sizes = [16, 32], strides = [1, 1]} : vector<16x96xbf16> to vector<16x32xbf16>
    %36 = vector.shape_cast %35 : vector<16x32xbf16> to vector<2x8x32xbf16>
    %37 = vector.extract_strided_slice %34 {offsets = [0, 32], sizes = [16, 32], strides = [1, 1]} : vector<16x96xbf16> to vector<16x32xbf16>
    %38 = vector.shape_cast %37 : vector<16x32xbf16> to vector<2x8x32xbf16>
    %39 = vector.extract_strided_slice %34 {offsets = [0, 64], sizes = [16, 32], strides = [1, 1]} : vector<16x96xbf16> to vector<16x32xbf16>
    %40 = vector.shape_cast %39 : vector<16x32xbf16> to vector<2x8x32xbf16>
    %cst_16 = arith.constant 0.000000e+00 : f32
    %41 = vector.broadcast %cst_16 : f32 to vector<16x32xf32>
    %42 = vector.extract_strided_slice %36 {offsets = [0, 0, 0], sizes = [2, 8, 8], strides = [1, 1, 1]} : vector<2x8x32xbf16> to vector<2x8x8xbf16>
    %43 = vector.extract_strided_slice %38 {offsets = [0, 0, 0], sizes = [2, 8, 8], strides = [1, 1, 1]} : vector<2x8x32xbf16> to vector<2x8x8xbf16>
    "tpu.trace_start"() <{level = 10 : i32, message = "bqd,bkd->bqk"}> : () -> ()
    %cst_17 = arith.constant dense<0.000000e+00> : vector<2x8x8xf32>
    %44 = tpu.matmul %42, %43, %cst_17 {dimension_numbers = #tpu.dot_dimension_numbers<[2], [2], [1], [1], [0, 0, 0, 1, 1, 1], [0], [0]>} : vector<2x8x8xbf16>, vector<2x8x8xbf16>, vector<2x8x8xf32> -> vector<2x8x8xf32>
    "tpu.trace_stop"() : () -> ()
    %cst_18 = arith.constant dense<0xFF800000> : vector<2x8xf32>
    %45 = vector.multi_reduction <maximumf>, %44, %cst_18 [2] : vector<2x8x8xf32> to vector<2x8xf32>
    %46 = vector.shape_cast %45 : vector<2x8xf32> to vector<2x8x1xf32>
    %47 = vector.broadcast %46 : vector<2x8x1xf32> to vector<2x8x8xf32>
    %48 = arith.subf %44, %47 : vector<2x8x8xf32>
    %49 = math.exp %48 : vector<2x8x8xf32>
    %cst_19 = arith.constant dense<0.000000e+00> : vector<2x8xf32>
    %50 = vector.multi_reduction <add>, %49, %cst_19 [2] : vector<2x8x8xf32> to vector<2x8xf32>
    %51 = vector.shape_cast %50 : vector<2x8xf32> to vector<2x8x1xf32>
    %52 = tpu.reciprocal %51 {approx = true} : vector<2x8x1xf32> -> vector<2x8x1xf32>
    %53 = vector.broadcast %52 : vector<2x8x1xf32> to vector<2x8x8xf32>
    %54 = arith.mulf %49, %53 : vector<2x8x8xf32>
    %55 = arith.truncf %54 : vector<2x8x8xf32> to vector<2x8x8xbf16>
    %56 = vector.extract_strided_slice %40 {offsets = [0, 0, 0], sizes = [2, 8, 8], strides = [1, 1, 1]} : vector<2x8x32xbf16> to vector<2x8x8xbf16>
    "tpu.trace_start"() <{level = 10 : i32, message = "bqk,bkd->bqd"}> : () -> ()
    %cst_20 = arith.constant dense<0.000000e+00> : vector<2x8x8xf32>
    %57 = tpu.matmul %55, %56, %cst_20 {dimension_numbers = #tpu.dot_dimension_numbers<[2], [1], [1], [2], [0, 0, 0, 1, 1, 2], [0], [0]>} : vector<2x8x8xbf16>, vector<2x8x8xbf16>, vector<2x8x8xf32> -> vector<2x8x8xf32>
    "tpu.trace_stop"() : () -> ()
    %58 = vector.shape_cast %57 : vector<2x8x8xf32> to vector<16x8xf32>
    %59 = arith.truncf %58 : vector<16x8xf32> to vector<16x8xbf16>
    %c0_21 = arith.constant 0 : index
    %c0_22 = arith.constant 0 : index
    %c0_23 = arith.constant 0 : index
    %c0_24 = arith.constant 0 : index
    %60 = vector.load %arg3[%c0_21, %c0_22, %c0_23, %c0_24] : memref<1x4x8x32xbf16, #tpu.memory_space<vmem>>, vector<1x1x8x32xbf16>
    %61 = vector.shape_cast %60 : vector<1x1x8x32xbf16> to vector<8x32xbf16>
    %cst_25 = arith.constant dense<0.000000e+00> : vector<16x32xf32>
    %62 = tpu.matmul %59, %61, %cst_25 {dimension_numbers = #tpu.dot_dimension_numbers<[1], [0], [0], [1], [0, 0, 1, 1], [], []>} : vector<16x8xbf16>, vector<8x32xbf16>, vector<16x32xf32> -> vector<16x32xf32>
    %63 = arith.addf %41, %62 : vector<16x32xf32>
    %64 = vector.extract_strided_slice %36 {offsets = [0, 0, 8], sizes = [2, 8, 8], strides = [1, 1, 1]} : vector<2x8x32xbf16> to vector<2x8x8xbf16>
    %65 = vector.extract_strided_slice %38 {offsets = [0, 0, 8], sizes = [2, 8, 8], strides = [1, 1, 1]} : vector<2x8x32xbf16> to vector<2x8x8xbf16>
    "tpu.trace_start"() <{level = 10 : i32, message = "bqd,bkd->bqk"}> : () -> ()
    %cst_26 = arith.constant dense<0.000000e+00> : vector<2x8x8xf32>
    %66 = tpu.matmul %64, %65, %cst_26 {dimension_numbers = #tpu.dot_dimension_numbers<[2], [2], [1], [1], [0, 0, 0, 1, 1, 1], [0], [0]>} : vector<2x8x8xbf16>, vector<2x8x8xbf16>, vector<2x8x8xf32> -> vector<2x8x8xf32>
    "tpu.trace_stop"() : () -> ()
    %cst_27 = arith.constant dense<0xFF800000> : vector<2x8xf32>
    %67 = vector.multi_reduction <maximumf>, %66, %cst_27 [2] : vector<2x8x8xf32> to vector<2x8xf32>
    %68 = vector.shape_cast %67 : vector<2x8xf32> to vector<2x8x1xf32>
    %69 = vector.broadcast %68 : vector<2x8x1xf32> to vector<2x8x8xf32>
    %70 = arith.subf %66, %69 : vector<2x8x8xf32>
    %71 = math.exp %70 : vector<2x8x8xf32>
    %cst_28 = arith.constant dense<0.000000e+00> : vector<2x8xf32>
    %72 = vector.multi_reduction <add>, %71, %cst_28 [2] : vector<2x8x8xf32> to vector<2x8xf32>
    %73 = vector.shape_cast %72 : vector<2x8xf32> to vector<2x8x1xf32>
    %74 = tpu.reciprocal %73 {approx = true} : vector<2x8x1xf32> -> vector<2x8x1xf32>
    %75 = vector.broadcast %74 : vector<2x8x1xf32> to vector<2x8x8xf32>
    %76 = arith.mulf %71, %75 : vector<2x8x8xf32>
    %77 = arith.truncf %76 : vector<2x8x8xf32> to vector<2x8x8xbf16>
    %78 = vector.extract_strided_slice %40 {offsets = [0, 0, 8], sizes = [2, 8, 8], strides = [1, 1, 1]} : vector<2x8x32xbf16> to vector<2x8x8xbf16>
    "tpu.trace_start"() <{level = 10 : i32, message = "bqk,bkd->bqd"}> : () -> ()
    %cst_29 = arith.constant dense<0.000000e+00> : vector<2x8x8xf32>
    %79 = tpu.matmul %77, %78, %cst_29 {dimension_numbers = #tpu.dot_dimension_numbers<[2], [1], [1], [2], [0, 0, 0, 1, 1, 2], [0], [0]>} : vector<2x8x8xbf16>, vector<2x8x8xbf16>, vector<2x8x8xf32> -> vector<2x8x8xf32>
    "tpu.trace_stop"() : () -> ()
    %80 = vector.shape_cast %79 : vector<2x8x8xf32> to vector<16x8xf32>
    %81 = arith.truncf %80 : vector<16x8xf32> to vector<16x8xbf16>
    %c0_30 = arith.constant 0 : index
    %c1 = arith.constant 1 : index
    %c0_31 = arith.constant 0 : index
    %c0_32 = arith.constant 0 : index
    %82 = vector.load %arg3[%c0_30, %c1, %c0_31, %c0_32] : memref<1x4x8x32xbf16, #tpu.memory_space<vmem>>, vector<1x1x8x32xbf16>
    %83 = vector.shape_cast %82 : vector<1x1x8x32xbf16> to vector<8x32xbf16>
    %cst_33 = arith.constant dense<0.000000e+00> : vector<16x32xf32>
    %84 = tpu.matmul %81, %83, %cst_33 {dimension_numbers = #tpu.dot_dimension_numbers<[1], [0], [0], [1], [0, 0, 1, 1], [], []>} : vector<16x8xbf16>, vector<8x32xbf16>, vector<16x32xf32> -> vector<16x32xf32>
    %85 = arith.addf %63, %84 : vector<16x32xf32>
    %86 = vector.extract_strided_slice %36 {offsets = [0, 0, 16], sizes = [2, 8, 8], strides = [1, 1, 1]} : vector<2x8x32xbf16> to vector<2x8x8xbf16>
    %87 = vector.extract_strided_slice %38 {offsets = [0, 0, 16], sizes = [2, 8, 8], strides = [1, 1, 1]} : vector<2x8x32xbf16> to vector<2x8x8xbf16>
    "tpu.trace_start"() <{level = 10 : i32, message = "bqd,bkd->bqk"}> : () -> ()
    %cst_34 = arith.constant dense<0.000000e+00> : vector<2x8x8xf32>
    %88 = tpu.matmul %86, %87, %cst_34 {dimension_numbers = #tpu.dot_dimension_numbers<[2], [2], [1], [1], [0, 0, 0, 1, 1, 1], [0], [0]>} : vector<2x8x8xbf16>, vector<2x8x8xbf16>, vector<2x8x8xf32> -> vector<2x8x8xf32>
    "tpu.trace_stop"() : () -> ()
    %cst_35 = arith.constant dense<0xFF800000> : vector<2x8xf32>
    %89 = vector.multi_reduction <maximumf>, %88, %cst_35 [2] : vector<2x8x8xf32> to vector<2x8xf32>
    %90 = vector.shape_cast %89 : vector<2x8xf32> to vector<2x8x1xf32>
    %91 = vector.broadcast %90 : vector<2x8x1xf32> to vector<2x8x8xf32>
    %92 = arith.subf %88, %91 : vector<2x8x8xf32>
    %93 = math.exp %92 : vector<2x8x8xf32>
    %cst_36 = arith.constant dense<0.000000e+00> : vector<2x8xf32>
    %94 = vector.multi_reduction <add>, %93, %cst_36 [2] : vector<2x8x8xf32> to vector<2x8xf32>
    %95 = vector.shape_cast %94 : vector<2x8xf32> to vector<2x8x1xf32>
    %96 = tpu.reciprocal %95 {approx = true} : vector<2x8x1xf32> -> vector<2x8x1xf32>
    %97 = vector.broadcast %96 : vector<2x8x1xf32> to vector<2x8x8xf32>
    %98 = arith.mulf %93, %97 : vector<2x8x8xf32>
    %99 = arith.truncf %98 : vector<2x8x8xf32> to vector<2x8x8xbf16>
    %100 = vector.extract_strided_slice %40 {offsets = [0, 0, 16], sizes = [2, 8, 8], strides = [1, 1, 1]} : vector<2x8x32xbf16> to vector<2x8x8xbf16>
    "tpu.trace_start"() <{level = 10 : i32, message = "bqk,bkd->bqd"}> : () -> ()
    %cst_37 = arith.constant dense<0.000000e+00> : vector<2x8x8xf32>
    %101 = tpu.matmul %99, %100, %cst_37 {dimension_numbers = #tpu.dot_dimension_numbers<[2], [1], [1], [2], [0, 0, 0, 1, 1, 2], [0], [0]>} : vector<2x8x8xbf16>, vector<2x8x8xbf16>, vector<2x8x8xf32> -> vector<2x8x8xf32>
    "tpu.trace_stop"() : () -> ()
    %102 = vector.shape_cast %101 : vector<2x8x8xf32> to vector<16x8xf32>
    %103 = arith.truncf %102 : vector<16x8xf32> to vector<16x8xbf16>
    %c0_38 = arith.constant 0 : index
    %c2 = arith.constant 2 : index
    %c0_39 = arith.constant 0 : index
    %c0_40 = arith.constant 0 : index
    %104 = vector.load %arg3[%c0_38, %c2, %c0_39, %c0_40] : memref<1x4x8x32xbf16, #tpu.memory_space<vmem>>, vector<1x1x8x32xbf16>
    %105 = vector.shape_cast %104 : vector<1x1x8x32xbf16> to vector<8x32xbf16>
    %cst_41 = arith.constant dense<0.000000e+00> : vector<16x32xf32>
    %106 = tpu.matmul %103, %105, %cst_41 {dimension_numbers = #tpu.dot_dimension_numbers<[1], [0], [0], [1], [0, 0, 1, 1], [], []>} : vector<16x8xbf16>, vector<8x32xbf16>, vector<16x32xf32> -> vector<16x32xf32>
    %107 = arith.addf %85, %106 : vector<16x32xf32>
    %108 = vector.extract_strided_slice %36 {offsets = [0, 0, 24], sizes = [2, 8, 8], strides = [1, 1, 1]} : vector<2x8x32xbf16> to vector<2x8x8xbf16>
    %109 = vector.extract_strided_slice %38 {offsets = [0, 0, 24], sizes = [2, 8, 8], strides = [1, 1, 1]} : vector<2x8x32xbf16> to vector<2x8x8xbf16>
    "tpu.trace_start"() <{level = 10 : i32, message = "bqd,bkd->bqk"}> : () -> ()
    %cst_42 = arith.constant dense<0.000000e+00> : vector<2x8x8xf32>
    %110 = tpu.matmul %108, %109, %cst_42 {dimension_numbers = #tpu.dot_dimension_numbers<[2], [2], [1], [1], [0, 0, 0, 1, 1, 1], [0], [0]>} : vector<2x8x8xbf16>, vector<2x8x8xbf16>, vector<2x8x8xf32> -> vector<2x8x8xf32>
    "tpu.trace_stop"() : () -> ()
    %cst_43 = arith.constant dense<0xFF800000> : vector<2x8xf32>
    %111 = vector.multi_reduction <maximumf>, %110, %cst_43 [2] : vector<2x8x8xf32> to vector<2x8xf32>
    %112 = vector.shape_cast %111 : vector<2x8xf32> to vector<2x8x1xf32>
    %113 = vector.broadcast %112 : vector<2x8x1xf32> to vector<2x8x8xf32>
    %114 = arith.subf %110, %113 : vector<2x8x8xf32>
    %115 = math.exp %114 : vector<2x8x8xf32>
    %cst_44 = arith.constant dense<0.000000e+00> : vector<2x8xf32>
    %116 = vector.multi_reduction <add>, %115, %cst_44 [2] : vector<2x8x8xf32> to vector<2x8xf32>
    %117 = vector.shape_cast %116 : vector<2x8xf32> to vector<2x8x1xf32>
    %118 = tpu.reciprocal %117 {approx = true} : vector<2x8x1xf32> -> vector<2x8x1xf32>
    %119 = vector.broadcast %118 : vector<2x8x1xf32> to vector<2x8x8xf32>
    %120 = arith.mulf %115, %119 : vector<2x8x8xf32>
    %121 = arith.truncf %120 : vector<2x8x8xf32> to vector<2x8x8xbf16>
    %122 = vector.extract_strided_slice %40 {offsets = [0, 0, 24], sizes = [2, 8, 8], strides = [1, 1, 1]} : vector<2x8x32xbf16> to vector<2x8x8xbf16>
    "tpu.trace_start"() <{level = 10 : i32, message = "bqk,bkd->bqd"}> : () -> ()
    %cst_45 = arith.constant dense<0.000000e+00> : vector<2x8x8xf32>
    %123 = tpu.matmul %121, %122, %cst_45 {dimension_numbers = #tpu.dot_dimension_numbers<[2], [1], [1], [2], [0, 0, 0, 1, 1, 2], [0], [0]>} : vector<2x8x8xbf16>, vector<2x8x8xbf16>, vector<2x8x8xf32> -> vector<2x8x8xf32>
    "tpu.trace_stop"() : () -> ()
    %124 = vector.shape_cast %123 : vector<2x8x8xf32> to vector<16x8xf32>
    %125 = arith.truncf %124 : vector<16x8xf32> to vector<16x8xbf16>
    %c0_46 = arith.constant 0 : index
    %c3 = arith.constant 3 : index
    %c0_47 = arith.constant 0 : index
    %c0_48 = arith.constant 0 : index
    %126 = vector.load %arg3[%c0_46, %c3, %c0_47, %c0_48] : memref<1x4x8x32xbf16, #tpu.memory_space<vmem>>, vector<1x1x8x32xbf16>
    %127 = vector.shape_cast %126 : vector<1x1x8x32xbf16> to vector<8x32xbf16>
    %cst_49 = arith.constant dense<0.000000e+00> : vector<16x32xf32>
    %128 = tpu.matmul %125, %127, %cst_49 {dimension_numbers = #tpu.dot_dimension_numbers<[1], [0], [0], [1], [0, 0, 1, 1], [], []>} : vector<16x8xbf16>, vector<8x32xbf16>, vector<16x32xf32> -> vector<16x32xf32>
    %129 = arith.addf %107, %128 : vector<16x32xf32>
    %130 = arith.addf %29, %129 : vector<16x32xf32>
    %c0_50 = arith.constant 0 : index
    %c0_51 = arith.constant 0 : index
    %c0_52 = arith.constant 0 : index
    %131 = vector.load %arg8[%c0_50, %c0_51, %c0_52] : memref<1x1x32xf32, #tpu.memory_space<vmem>>, vector<1x1x32xf32>
    %132 = vector.shape_cast %131 : vector<1x1x32xf32> to vector<1x32xf32>
    %c0_53 = arith.constant 0 : index
    %c0_54 = arith.constant 0 : index
    %c0_55 = arith.constant 0 : index
    %133 = vector.load %arg9[%c0_53, %c0_54, %c0_55] : memref<1x1x32xf32, #tpu.memory_space<vmem>>, vector<1x1x32xf32>
    %134 = vector.shape_cast %133 : vector<1x1x32xf32> to vector<1x32xf32>
    %cst_56 = arith.constant dense<0.000000e+00> : vector<16xf32>
    %135 = vector.multi_reduction <add>, %130, %cst_56 [1] : vector<16x32xf32> to vector<16xf32>
    %136 = vector.shape_cast %135 : vector<16xf32> to vector<16x1xf32>
    %cst_57 = arith.constant 3.200000e+01 : f32
    %137 = vector.broadcast %cst_57 : f32 to vector<16x1xf32>
    %138 = arith.divf %136, %137 : vector<16x1xf32>
    %139 = vector.broadcast %138 : vector<16x1xf32> to vector<16x32xf32>
    %140 = arith.subf %130, %139 : vector<16x32xf32>
    %141 = arith.mulf %140, %140 : vector<16x32xf32>
    %cst_58 = arith.constant dense<0.000000e+00> : vector<16xf32>
    %142 = vector.multi_reduction <add>, %141, %cst_58 [1] : vector<16x32xf32> to vector<16xf32>
    %143 = vector.shape_cast %142 : vector<16xf32> to vector<16x1xf32>
    %cst_59 = arith.constant 0.0322580636 : f32
    %144 = vector.broadcast %cst_59 : f32 to vector<16x1xf32>
    %145 = arith.mulf %143, %144 : vector<16x1xf32>
    %146 = math.sqrt %145 : vector<16x1xf32>
    %147 = vector.broadcast %138 : vector<16x1xf32> to vector<16x32xf32>
    %148 = arith.subf %130, %147 : vector<16x32xf32>
    %149 = vector.broadcast %132 : vector<1x32xf32> to vector<16x32xf32>
    %150 = arith.mulf %149, %148 : vector<16x32xf32>
    %cst_60 = arith.constant 9.99999997E-7 : f32
    %151 = vector.broadcast %cst_60 : f32 to vector<16x1xf32>
    %152 = arith.addf %146, %151 : vector<16x1xf32>
    %153 = vector.broadcast %152 : vector<16x1xf32> to vector<16x32xf32>
    %154 = arith.divf %150, %153 : vector<16x32xf32>
    %155 = vector.broadcast %134 : vector<1x32xf32> to vector<16x32xf32>
    %156 = arith.addf %154, %155 : vector<16x32xf32>
    %157 = arith.truncf %156 : vector<16x32xf32> to vector<16x32xbf16>
    %c0_61 = arith.constant 0 : index
    %c0_62 = arith.constant 0 : index
    %c0_63 = arith.constant 0 : index
    %158 = vector.load %arg4[%c0_61, %c0_62, %c0_63] : memref<1x32x32xbf16, #tpu.memory_space<vmem>>, vector<1x32x32xbf16>
    %159 = vector.shape_cast %158 : vector<1x32x32xbf16> to vector<32x32xbf16>
    %cst_64 = arith.constant dense<0.000000e+00> : vector<16x32xf32>
    %160 = tpu.matmul %157, %159, %cst_64 {dimension_numbers = #tpu.dot_dimension_numbers<[1], [0], [0], [1], [0, 0, 1, 1], [], []>} : vector<16x32xbf16>, vector<32x32xbf16>, vector<16x32xf32> -> vector<16x32xf32>
    %cst_65 = arith.constant 0.000000e+00 : f32
    %161 = vector.broadcast %cst_65 : f32 to vector<16x32xf32>
    %162 = arith.maximumf %160, %161 : vector<16x32xf32>
    %163 = arith.truncf %162 : vector<16x32xf32> to vector<16x32xbf16>
    %c0_66 = arith.constant 0 : index
    %c0_67 = arith.constant 0 : index
    %c0_68 = arith.constant 0 : index
    %164 = vector.load %arg5[%c0_66, %c0_67, %c0_68] : memref<1x32x32xbf16, #tpu.memory_space<vmem>>, vector<1x32x32xbf16>
    %165 = vector.shape_cast %164 : vector<1x32x32xbf16> to vector<32x32xbf16>
    %cst_69 = arith.constant dense<0.000000e+00> : vector<16x32xf32>
    %166 = tpu.matmul %163, %165, %cst_69 {dimension_numbers = #tpu.dot_dimension_numbers<[1], [0], [0], [1], [0, 0, 1, 1], [], []>} : vector<16x32xbf16>, vector<32x32xbf16>, vector<16x32xf32> -> vector<16x32xf32>
    %167 = arith.addf %130, %166 : vector<16x32xf32>
    %c0_70 = arith.constant 0 : index
    %c0_71 = arith.constant 0 : index
    %168 = vector.load %arg13[%c0_70, %c0_71] : memref<16x32xf32, #tpu.memory_space<vmem>>, vector<16x32xf32>
    tpu.vector_store %arg13[%c0_70, %c0_71], %167 {strides = array<i32>} : memref<16x32xf32, #tpu.memory_space<vmem>>, vector<16x32xf32>,
    %c1_i32 = arith.constant 1 : i32
    %169 = arith.cmpi eq, %arg0, %c1_i32 : i32
    %170 = arith.extui %169 : i1 to i32
    %c0_i32_72 = arith.constant 0 : i32
    %171 = arith.cmpi ne, %170, %c0_i32_72 : i32
    scf.if %171 {
      %c0_73 = arith.constant 0 : index
      %c0_74 = arith.constant 0 : index
      %172 = vector.load %arg10[%c0_73, %c0_74] : memref<1x32xf32, #tpu.memory_space<vmem>>, vector<1x32xf32>
      %c0_75 = arith.constant 0 : index
      %c0_76 = arith.constant 0 : index
      %173 = vector.load %arg11[%c0_75, %c0_76] : memref<1x32xf32, #tpu.memory_space<vmem>>, vector<1x32xf32>
      %cst_77 = arith.constant dense<0.000000e+00> : vector<16xf32>
      %174 = vector.multi_reduction <add>, %167, %cst_77 [1] : vector<16x32xf32> to vector<16xf32>
      %175 = vector.shape_cast %174 : vector<16xf32> to vector<16x1xf32>
      %cst_78 = arith.constant 3.200000e+01 : f32
      %176 = vector.broadcast %cst_78 : f32 to vector<16x1xf32>
      %177 = arith.divf %175, %176 : vector<16x1xf32>
      %178 = vector.broadcast %177 : vector<16x1xf32> to vector<16x32xf32>
      %179 = arith.subf %167, %178 : vector<16x32xf32>
      %180 = arith.mulf %179, %179 : vector<16x32xf32>
      %cst_79 = arith.constant dense<0.000000e+00> : vector<16xf32>
      %181 = vector.multi_reduction <add>, %180, %cst_79 [1] : vector<16x32xf32> to vector<16xf32>
      %182 = vector.shape_cast %181 : vector<16xf32> to vector<16x1xf32>
      %cst_80 = arith.constant 0.0322580636 : f32
      %183 = vector.broadcast %cst_80 : f32 to vector<16x1xf32>
      %184 = arith.mulf %182, %183 : vector<16x1xf32>
      %185 = math.sqrt %184 : vector<16x1xf32>
      %186 = vector.broadcast %177 : vector<16x1xf32> to vector<16x32xf32>
      %187 = arith.subf %167, %186 : vector<16x32xf32>
      %188 = vector.broadcast %172 : vector<1x32xf32> to vector<16x32xf32>
      %189 = arith.mulf %188, %187 : vector<16x32xf32>
      %cst_81 = arith.constant 9.99999997E-7 : f32
      %190 = vector.broadcast %cst_81 : f32 to vector<16x1xf32>
      %191 = arith.addf %185, %190 : vector<16x1xf32>
      %192 = vector.broadcast %191 : vector<16x1xf32> to vector<16x32xf32>
      %193 = arith.divf %189, %192 : vector<16x32xf32>
      %194 = vector.broadcast %173 : vector<1x32xf32> to vector<16x32xf32>
      %195 = arith.addf %193, %194 : vector<16x32xf32>
      %196 = vector.shape_cast %195 : vector<16x32xf32> to vector<2x8x32xf32>
      %c0_82 = arith.constant 0 : index
      %c0_83 = arith.constant 0 : index
      %c0_84 = arith.constant 0 : index
      %197 = vector.load %arg12[%c0_82, %c0_83, %c0_84] : memref<2x8x32xf32, #tpu.memory_space<vmem>>, vector<2x8x32xf32>
      tpu.vector_store %arg12[%c0_82, %c0_83, %c0_84], %196 {strides = array<i32>} : memref<2x8x32xf32, #tpu.memory_space<vmem>>, vector<2x8x32xf32>,
    } else {
    }
    return
  }
  func.func @transform_0(%arg0: i32) -> (i32, i32, i32) {
    %c0_i32 = arith.constant 0 : i32
    %c0_i32_0 = arith.constant 0 : i32
    %c0_i32_1 = arith.constant 0 : i32
    %c0_i32_2 = arith.constant 0 : i32
    return %c0_i32, %c0_i32_0, %c0_i32_1 : i32, i32, i32
  }
  func.func @transform_1(%arg0: i32) -> (i32, i32, i32) {
    %c0_i32 = arith.constant 0 : i32
    %c0_i32_0 = arith.constant 0 : i32
    %c0_i32_1 = arith.constant 0 : i32
    return %arg0, %c0_i32, %c0_i32_0 : i32, i32, i32
  }
  func.func @transform_2(%arg0: i32) -> (i32, i32, i32, i32) {
    %c0_i32 = arith.constant 0 : i32
    %c0_i32_0 = arith.constant 0 : i32
    %c0_i32_1 = arith.constant 0 : i32
    %c0_i32_2 = arith.constant 0 : i32
    return %arg0, %c0_i32, %c0_i32_0, %c0_i32_1 : i32, i32, i32, i32
  }
  func.func @transform_3(%arg0: i32) -> (i32, i32, i32) {
    %c0_i32 = arith.constant 0 : i32
    %c0_i32_0 = arith.constant 0 : i32
    %c0_i32_1 = arith.constant 0 : i32
    return %arg0, %c0_i32, %c0_i32_0 : i32, i32, i32
  }
  func.func @transform_4(%arg0: i32) -> (i32, i32, i32) {
    %c0_i32 = arith.constant 0 : i32
    %c0_i32_0 = arith.constant 0 : i32
    %c0_i32_1 = arith.constant 0 : i32
    return %arg0, %c0_i32, %c0_i32_0 : i32, i32, i32
  }
  func.func @transform_5(%arg0: i32) -> (i32, i32, i32) {
    %c0_i32 = arith.constant 0 : i32
    %c0_i32_0 = arith.constant 0 : i32
    %c0_i32_1 = arith.constant 0 : i32
    return %arg0, %c0_i32, %c0_i32_0 : i32, i32, i32
  }
  func.func @transform_6(%arg0: i32) -> (i32, i32, i32) {
    %c0_i32 = arith.constant 0 : i32
    %c0_i32_0 = arith.constant 0 : i32
    %c0_i32_1 = arith.constant 0 : i32
    return %arg0, %c0_i32, %c0_i32_0 : i32, i32, i32
  }
  func.func @transform_7(%arg0: i32) -> (i32, i32, i32) {
    %c0_i32 = arith.constant 0 : i32
    %c0_i32_0 = arith.constant 0 : i32
    %c0_i32_1 = arith.constant 0 : i32
    return %arg0, %c0_i32, %c0_i32_0 : i32, i32, i32
  }
  func.func @transform_8(%arg0: i32) -> (i32, i32, i32) {
    %c0_i32 = arith.constant 0 : i32
    %c0_i32_0 = arith.constant 0 : i32
    %c0_i32_1 = arith.constant 0 : i32
    return %arg0, %c0_i32, %c0_i32_0 : i32, i32, i32
  }
  func.func @transform_9(%arg0: i32) -> (i32, i32) {
    %c0_i32 = arith.constant 0 : i32
    %c0_i32_0 = arith.constant 0 : i32
    %c0_i32_1 = arith.constant 0 : i32
    return %c0_i32, %c0_i32_0 : i32, i32
  }
  func.func @transform_10(%arg0: i32) -> (i32, i32) {
    %c0_i32 = arith.constant 0 : i32
    %c0_i32_0 = arith.constant 0 : i32
    %c0_i32_1 = arith.constant 0 : i32
    return %c0_i32, %c0_i32_0 : i32, i32
  }
  func.func @transform_11(%arg0: i32) -> (i32, i32, i32) {
    %c0_i32 = arith.constant 0 : i32
    %c0_i32_0 = arith.constant 0 : i32
    %c0_i32_1 = arith.constant 0 : i32
    %c0_i32_2 = arith.constant 0 : i32
    return %c0_i32, %c0_i32_0, %c0_i32_1 : i32, i32, i32
  }
}

</mosaic_0001>

<bundles_post_ra>
// kernel: tpu_custom_call.1
= control target key start
LH: loop header
LB: loop body
LE: loop exit
PB: predicated region body
PF: predicated region fallthrough
CT: control target
= control target key end

     0   :  { %s3521_s0 = inlined_call_operand.hbm [shape: f32[2,8,32], index: 0, kind: input, shape index: {}]   ;;  %s3522_s1 = inlined_call_operand.hbm [shape: bf16[2,32,96], index: 1, kind: input, shape index: {}]   ;;  %s3523_s2 = inlined_call_operand.hbm [shape: bf16[2,4,8,32], index: 2, kind: input, shape index: {}]   ;;  %s3524_s3 = inlined_call_operand.hbm [shape: bf16[2,32,32], index: 3, kind: input, shape index: {}]   ;;  %s3525_s4 = inlined_call_operand.hbm [shape: bf16[2,32,32], index: 4, kind: input, shape index: {}]   ;;  %s3526_s5 = inlined_call_operand.vmem [shape: f32[2,1,32], index: 5, kind: input, shape index: {}]   ;;  %s3527_s6 = inlined_call_operand.vmem [shape: f32[2,1,32], index: 6, kind: input, shape index: {}]   ;;  %s3528_s7 = inlined_call_operand.vmem [shape: f32[2,1,32], index: 7, kind: input, shape index: {}]   ;;  %s3529_s8 = inlined_call_operand.vmem [shape: f32[2,1,32], index: 8, kind: input, shape index: {}]   ;;  %s3530_s9 = inlined_call_operand.vmem [shape: f32[1,32], index: 9, kind: input, shape index: {}]   ;;  %s3531_s10 = inlined_call_operand.vmem [shape: f32[1,32], index: 10, kind: input, shape index: {}]   ;;  %s3532_s11 = inlined_call_operand.hbm [shape: f32[2,8,32], index: 11, kind: output, shape index: {}]  }
   0x1   :  { %3549 = sst [smem:[#allocation20_spill]] %s3522_s1 }
   0x2   :  { %3550 = sst [smem:[#allocation21_spill]] %s3524_s3 }
   0x3   :  { %3551 = sst [smem:[#allocation22_spill]] %s3529_s8 }
   0x4   :  { %3552 = sst [smem:[#allocation23_spill]] %s3530_s9 }
   0x5   :  { %3553 = sst [smem:[#allocation24_spill]] %s3531_s10 }
   0x6   :  { %3554 = sst [smem:[#allocation25_spill]] %s3532_s11 }
   0x7   :  { %16 = vsyncpa [#allocation4], 0 }
   0x8   :  { %17 = vsyncpa [#allocation7], 0 }
   0x9   :  { %19 = vsyncpa [#allocation7 + $0x1], 0 }
   0xa   :  { %20 = vsyncpa [#allocation10], 0 }
   0xb   :  { %22 = vsyncpa [#allocation10 + $0x1], 0 }
   0xc   :  { %23 = vsyncpa [#allocation5], 0  ;;  %s2947_s17 = smov 0   ;;  %s2949_s18 = smov 0  }
   0xd   :  { %s2951_s19 = smov 0   ;;  %s2953_s20 = smov 0  }
   0xe LB: > { %3555 = sst [smem:[#allocation17_spill]] %s2856_s19  ;;  %s2968_s21 = sadd.s32 1, %s2860_s20   ;;  %s2860_s20 = sphi %s2953_s20, %s3580_s20   ;;  %s2856_s19 = sphi %s2951_s19, %s3582_s19   ;;  %s2852_s18 = sphi %s2949_s18, %s3584_s18   ;;  %s2848_s17 = sphi %s2947_s17, %s3583_s17  }
   0xf   : > { %3556 = sst [smem:[#allocation18_spill]] %s2968_s21  ;;  %s57_s22 = sadd.s32 1, %s2856_s19 }
  0x10   : > { %s54_s23 = ssub.s32 %s2860_s20, %s2968_s21  ;;  %p64_p0 = scmp.ne.s32.totalorder %s2856_s19, %s2852_s18 }
  0x11   : > { %p55_p1 = scmp.eq.s32.totalorder %s54_s23, 0  ;;  %p65_p2 = scmp.eq.s32.totalorder %s2860_s20, 0 }
  0x12   : > { %p2521_p3 = scmp.lt.s32.totalorder %s2860_s20, 2  ;;  %s3533_s25 = sand.u32 1, %s2860_s20  }
  0x13   : > { %s2978_s24 = scalar_select %p55_p1, %s2856_s19, %s57_s22  }
  0x14   : > { %p66_p4 = por %p65_p2, %p64_p0  ;;  %s360_s26 = sand.u32 1, %s2856_s19  }
  0x15   : > { %3557 = sst [smem:[#allocation19_spill]] %s2978_s24  ;;  %s2982_s27 = sshll.u32 %s360_s26, 4 }
  0x16   : > { %s2985_s28 = sshll.u32 %s2860_s20, 8  ;;  %s3558_s1 = sld [smem:[#allocation20_spill]] }
  0x17   : > { %s362_s13 = scalar_lea.vmem [#allocation6], %s2982_s27  ;;  %p2994_p5 = pnand %p2521_p3, %p66_p4 }
  0x18   : > { %s369_s14 = sshll.u32 %s362_s13, 4  ;;  %s3002_s16 = scalar_lea.sflag [#allocation7], %s3533_s25  ;;  %s2998_s14 = int_to_ptr.vmem [resolvable:$true] %s369_s14 }
  0x19   : > { %s3559_s15 = scalar_select %p2994_p5, 1, 0 }
  0x1a   : > { %p3008_p7 = pneg %p2994_p5 }
  0x1c   : > { %s2991_s12 = scalar_lea.hbm %s3558_s1, %s2985_s28  ;;  %s2645_s30 = scalar_lea.hbm %s3558_s1, 512 }
  0x1d   : > { %s2640_s22 = scalar_lea.hbm %s2991_s12, 256  ;;  %p2646_p10 = scmp.lt.u32.totalorder %s2991_s12, %s3558_s1 }
  0x1e   : > { %p2641_p6 = scmp.ne.s32.totalorder %s2991_s12, %s2640_s22  ;;  %p2647_p11 = scmp.lt.u32.totalorder %s2645_s30, %s2640_s22 }
  0x1f   : > { %s3560_s23 = scalar_select %p3008_p7, 1, 0 }
  0x20   : > { %p2643_p8 = pnand %p3008_p7, %p2641_p6  ;;  %p2648_p12 = por %p2647_p11, %p2646_p10 }
  0x21   : > { %p2649_p13 = scmp.lt.u32.totalorder %s2640_s22, %s2991_s12 }
  0x22   : > { %p2644_p9 = pneg %p2643_p8 }
  0x23   : > { %p2650_p0 = por %p2649_p13, %p2648_p12 }
  0x25   : > { %p2651_p1 = pnand %p2650_p0, %p2644_p9 }
  0x27   : > { %2654 = shalt.err (!%p2651_p1)
}
  0x28   : > { %s2655_s25 = scalar_lea.vmem %s2998_s14, 256  ;;  %s2862_s26 = smov [#allocation6]  }
  0x29   : > { %p2656_p2 = scmp.ne.s32.totalorder %s2998_s14, %s2655_s25  ;;  %s2660_s29 = sshll.u32 %s2862_s26, 4  ;;  %s2661_s29 = int_to_ptr.vmem [resolvable:$false] %s2660_s29 }
  0x2a   : > { %s2662_s24 = scalar_lea.vmem %s2661_s29, 512  ;;  %p2663_p6 = scmp.lt.s32.totalorder %s2998_s14, %s2661_s29 }
  0x2b   : > { %p2658_p3 = pnand %p2656_p2, %p3008_p7  ;;  %p2664_p8 = scmp.lt.s32.totalorder %s2662_s24, %s2655_s25 }
  0x2d   : > { %p2659_p4 = pneg %p2658_p3  ;;  %p2665_p10 = por %p2664_p8, %p2663_p6 }
  0x2f   : > { %p2666_p11 = pnand %p2665_p10, %p2659_p4 }
  0x31   : > { %2669 = shalt.err (!%p2666_p11)
}
  0x32   : > { %s3537_s22 = smov 64   ;;  %s3539_s30 = smov 4  }
  0x33   : > { %2510 = dma.hbm_to_vmem [thread:$0]  (!%p2994_p5), %s2991_s12, 256, %s2998_s14, %s3002_s16, %s3537_s22, %s3537_s22, %s3539_s30  }
  0x34   : > { %s3561_s3 = sld [smem:[#allocation21_spill]]  ;;  %s404_s29 = scalar_lea.vmem [#allocation9], %s2982_s27 }
  0x35   : > { %s411_s24 = sshll.u32 %s404_s29, 4  ;;  %s3562_s1 = sand.u32 1, %s2860_s20   ;;  %s3042_s24 = int_to_ptr.vmem [resolvable:$true] %s411_s24 }
  0x36   : > { %s3046_s19 = scalar_lea.sflag [#allocation10], %s3562_s1 }
  0x3a   : > { %s3039_s26 = scalar_lea.hbm %s3561_s3, %s2985_s28  ;;  %s2675_s13 = scalar_lea.hbm %s3561_s3, 512 }
  0x3b   : > { %s2670_s21 = scalar_lea.hbm %s3039_s26, 256  ;;  %p2676_p0 = scmp.lt.u32.totalorder %s3039_s26, %s3561_s3 }
  0x3c   : > { %p2671_p9 = scmp.ne.s32.totalorder %s3039_s26, %s2670_s21  ;;  %p2677_p1 = scmp.lt.u32.totalorder %s2675_s13, %s2670_s21 }
  0x3d   : > { %p2679_p3 = scmp.lt.u32.totalorder %s2670_s21, %s3039_s26 }
  0x3e   : > { %p2673_p12 = pnand %p2671_p9, %p3008_p7  ;;  %p2678_p2 = por %p2677_p1, %p2676_p0 }
  0x40   : > { %p2674_p13 = pneg %p2673_p12  ;;  %p2680_p4 = por %p2679_p3, %p2678_p2 }
  0x42   : > { %p2681_p6 = pnand %p2680_p4, %p2674_p13 }
  0x44   : > { %2684 = shalt.err (!%p2681_p6)
}
  0x45   : > { %s2685_s1 = scalar_lea.vmem %s3042_s24, 256  ;;  %s2865_s29 = smov [#allocation9]  }
  0x46   : > { %p2686_p8 = scmp.ne.s32.totalorder %s3042_s24, %s2685_s1  ;;  %s2690_s12 = sshll.u32 %s2865_s29, 4  ;;  %s2691_s12 = int_to_ptr.vmem [resolvable:$false] %s2690_s12 }
  0x47   : > { %s2692_s22 = scalar_lea.vmem %s2691_s12, 512  ;;  %p2693_p9 = scmp.lt.s32.totalorder %s3042_s24, %s2691_s12 }
  0x48   : > { %p2688_p10 = pnand %p2686_p8, %p3008_p7  ;;  %p2694_p12 = scmp.lt.s32.totalorder %s2692_s22, %s2685_s1 }
  0x4a   : > { %p2689_p11 = pneg %p2688_p10  ;;  %p2695_p0 = por %p2694_p12, %p2693_p9 }
  0x4c   : > { %p2696_p1 = pnand %p2695_p0, %p2689_p11 }
  0x4e   : > { %2699 = shalt.err (!%p2696_p1)
}
  0x4f   : > { %s3563_s21 = smov 64   ;;  %s3074_s14 = sadd.s32 4294967295, %s2860_s20  }
  0x50   : > { %2516 = dma.hbm_to_vmem [thread:$0]  (!%p2994_p5), %s3039_s26, 256, %s3042_s24, %s3046_s19, %s3563_s21, %s3563_s21, %s3539_s30  }
  0x51   : > { %p70_p13 = scmp.ne.s32.totalorder %s2852_s18, %s2848_s17  ;;  %p3542_p2 = scmp.eq.s32.totalorder %s3074_s14, 0 }
  0x52   : > { %p2221_p3 = scmp.ge.s32.totalorder %s2860_s20, 1  ;;  %p326_p4 = scmp.lt.s32.totalorder %s2860_s20, 3 }
  0x53   : > { %p3083_p6 = por %p3542_p2, %p70_p13  ;;  %s2866_s26 = smov [#allocation3]  }
  0x54   : > { %p3088_p10 = pnand %p2221_p3, %p326_p4  ;;  %s338_s24 = sshll.u32 %s2866_s26, 4  ;;  %s339_s24 = int_to_ptr.vmem [resolvable:$true] %s338_s24 }
  0x55   : > { %s3564_s13 = scalar_select %p3083_p6, 1, 0 }
  0x56   : > { %s3565_s25 = scalar_select %p3088_p10, 1, 0 }
  0x57   : > { %p2503_p11 = pneg %p3088_p10  ;;  %s3104_s29 = scalar_lea.hbm %s3523_s2, %s2985_s28 }
  0x58   : > { %s383_s12 = scalar_lea.vmem [#allocation8], %s2982_s27  ;;  %s2700_s3 = scalar_lea.hbm %s3521_s0, 256 }
  0x59   : > { %p3096_p9 = pnand %p2503_p11, %p3542_p2  ;;  %s390_s22 = sshll.u32 %s383_s12, 4  ;;  %s3107_s22 = int_to_ptr.vmem [resolvable:$true] %s390_s22 }
  0x5a   : > { %p2701_p12 = scmp.ne.s32.totalorder %s3521_s0, %s2700_s3  ;;  %p2707_p3 = scmp.lt.u32.totalorder %s2700_s3, %s3521_s0 }
  0x5b   : > { %p2702_p0 = pneg %p3096_p9 }
  0x5d   : > { %p2703_p1 = pnand %p2702_p0, %p2701_p12 }
  0x5f   : > { %p2704_p13 = pneg %p2703_p1 }
  0x61   : > { %p2709_p4 = pnand %p2707_p3, %p2704_p13 }
  0x63   : > { %2712 = shalt.err (!%p2709_p4)
}
  0x64   : > { %s2713_s12 = scalar_lea.vmem %s339_s24, 256  ;;  %p2721_p6 = scmp.lt.s32.totalorder %s339_s24, %s339_s24 }
  0x65   : > { %p2714_p11 = scmp.ne.s32.totalorder %s339_s24, %s2713_s12  ;;  %p2722_p10 = scmp.lt.s32.totalorder %s2713_s12, %s2713_s12 }
  0x67   : > { %p2716_p8 = pnand %p2714_p11, %p2702_p0  ;;  %p2723_p5 = por %p2722_p10, %p2721_p6 }
  0x69   : > { %p2717_p2 = pneg %p2716_p8 }
  0x6b   : > { %p2724_p7 = pnand %p2723_p5, %p2717_p2 }
  0x6d   : > { %2727 = shalt.err (!%p2724_p7)
}
  0x6e   : > { %s2867_s10 = smov 128   ;;  %s2868_s11 = smov 8  }
  0x6f   : > { %2506 = dma.hbm_to_vmem [thread:$0]  (!%p3096_p9), %s3521_s0, 256, %s339_s24, [#allocation4], %s2867_s10, %s2867_s10, %s2868_s11  }
  0x70   : > { %s2728_s26 = scalar_lea.hbm %s3104_s29, 256  ;;  %p3567_p12 = scmp.ne.s32.totalorder %s3560_s23, 0 }
  0x71   : > { %p2729_p8 = scmp.ne.s32.totalorder %s3104_s29, %s2728_s26  ;;  %s2733_s12 = scalar_lea.hbm %s3523_s2, 512 }
  0x72   : > { %p2734_p5 = scmp.lt.u32.totalorder %s3104_s29, %s3523_s2  ;;  %p2735_p7 = scmp.lt.u32.totalorder %s2733_s12, %s2728_s26 }
  0x73   : > { %p2731_p0 = pnand %p2729_p8, %p3567_p12  ;;  %p2737_p10 = scmp.lt.u32.totalorder %s2728_s26, %s3104_s29 }
  0x74   : > { %p2736_p2 = por %p2735_p7, %p2734_p5 }
  0x75   : > { %p2732_p6 = pneg %p2731_p0 }
  0x76   : > { %p2738_p1 = por %p2737_p10, %p2736_p2 }
  0x78   : > { %p2739_p13 = pnand %p2738_p1, %p2732_p6 }
  0x7a   : > { %2742 = shalt.err (!%p2739_p13)
}
  0x7b   : > { %s2743_s24 = scalar_lea.vmem %s3107_s22, 256  ;;  %s2869_s17 = smov [#allocation8]  }
  0x7c   : > { %p2744_p9 = scmp.ne.s32.totalorder %s3107_s22, %s2743_s24  ;;  %s2748_s10 = sshll.u32 %s2869_s17, 4  ;;  %s2749_s10 = int_to_ptr.vmem [resolvable:$false] %s2748_s10 }
  0x7d   : > { %s2750_s8 = scalar_lea.vmem %s2749_s10, 512  ;;  %p2751_p11 = scmp.lt.s32.totalorder %s3107_s22, %s2749_s10 }
  0x7e   : > { %p2746_p3 = pnand %p2744_p9, %p3567_p12  ;;  %p2752_p8 = scmp.lt.s32.totalorder %s2750_s8, %s2743_s24 }
  0x80   : > { %p2747_p4 = pneg %p2746_p3  ;;  %p2753_p0 = por %p2752_p8, %p2751_p11 }
  0x82   : > { %p2754_p5 = pnand %p2753_p0, %p2747_p4 }
  0x84   : > { %2757 = shalt.err (!%p2754_p5)
}
  0x85   : > { %p3568_p6 = scmp.ne.s32.totalorder %s3559_s15, 0  ;;  %s3569_s9 = smov 4  }
  0x86   : > { %s3154_s30 = scalar_lea.hbm %s3525_s4, %s2985_s28  ;;  %s425_s26 = scalar_lea.vmem [#allocation11], %s2982_s27 }
  0x87   : > { %2513 = dma.hbm_to_vmem [thread:$0]  (!%p3568_p6), %s3104_s29, 256, %s3107_s22, %s3002_s16, %s3563_s21, %s3563_s21, %s3569_s9  }
  0x88   : > { %s432_s20 = sshll.u32 %s425_s26, 4  ;;  %s2758_s1 = scalar_lea.hbm %s3154_s30, 256  ;;  %s3157_s20 = int_to_ptr.vmem [resolvable:$true] %s432_s20 }
  0x89   : > { %p2759_p7 = scmp.ne.s32.totalorder %s3154_s30, %s2758_s1  ;;  %s2763_s29 = scalar_lea.hbm %s3525_s4, 512 }
  0x8a   : > { %p2764_p1 = scmp.lt.u32.totalorder %s3154_s30, %s3525_s4  ;;  %p2765_p13 = scmp.lt.u32.totalorder %s2763_s29, %s2758_s1 }
  0x8b   : > { %p2761_p2 = pnand %p2759_p7, %p3567_p12  ;;  %p2767_p3 = scmp.lt.u32.totalorder %s2758_s1, %s3154_s30 }
  0x8c   : > { %p2766_p9 = por %p2765_p13, %p2764_p1 }
  0x8d   : > { %p2762_p10 = pneg %p2761_p2 }
  0x8e   : > { %p2768_p4 = por %p2767_p3, %p2766_p9 }
  0x90   : > { %p2769_p11 = pnand %p2768_p4, %p2762_p10 }
  0x92   : > { %2772 = shalt.err (!%p2769_p11)
}
  0x93   : > { %s2773_s27 = scalar_lea.vmem %s3157_s20, 256  ;;  %s2870_s24 = smov [#allocation11]  }
  0x94   : > { %p2774_p8 = scmp.ne.s32.totalorder %s3157_s20, %s2773_s27  ;;  %s2778_s17 = sshll.u32 %s2870_s24, 4  ;;  %s2779_s17 = int_to_ptr.vmem [resolvable:$false] %s2778_s17 }
  0x95   : > { %s2780_s10 = scalar_lea.vmem %s2779_s17, 512  ;;  %p2781_p7 = scmp.lt.s32.totalorder %s3157_s20, %s2779_s17 }
  0x96   : > { %p2776_p0 = pnand %p2774_p8, %p3567_p12  ;;  %p2782_p2 = scmp.lt.s32.totalorder %s2780_s10, %s2773_s27 }
  0x98   : > { %p2777_p5 = pneg %p2776_p0  ;;  %p2783_p1 = por %p2782_p2, %p2781_p7 }
  0x9a   : > { %p2784_p13 = pnand %p2783_p1, %p2777_p5 }
  0x9c   : > { %2787 = shalt.err (!%p2784_p13)
}
  0x9d   : > { %2519 = dma.hbm_to_vmem [thread:$0]  (!%p3568_p6), %s3154_s30, 256, %s3157_s20, %s3046_s19, %s3563_s21, %s3563_s21, %s3569_s9  }
  0x9e   : > { %p3570_p12 = scmp.ne.s32.totalorder %s3565_s25, 0 }
  0x9f   : > { %p3571_p10 = scmp.eq.s32.totalorder (!%p3570_p12), %s3074_s14, 0 }
  0xa0   : > { %468 = sbr.rel (%p3570_p12) target bundleno = 4980 (0x1374), region = 64 }
  0xa7   : > { %2831 = dma.done.wait (%p3571_p10), [#allocation4], 256   ;;  %p3572_p9 = pmov %p3571_p10 }
  0xa8   : > { %s474_s15 = sand.u32 1, %s3074_s14   ;;  %s476_s23 = sand.u32 1, %s2852_s18  }
  0xa9   : > { %2833 = vsyncadd (%p3572_p9), [#allocation4], 4294967040  ;;  %s3192_s8 = sshll.u32 %s476_s23, 4  ;;  %s475_s11 = scalar_lea.sflag [#allocation7], %s474_s15 }
  0xaa   : > { %s478_s3 = scalar_lea.vmem [#allocation6], %s3192_s8  ;;  %p3573_p6 = scmp.ne.s32.totalorder %s3564_s13, 0 }
  0xac   : > { %2835 = dma.done.wait (%p3573_p6), %s475_s11, 512  }
  0xad   : > { %2837 = vsyncadd (%p3573_p6), %s475_s11, 4294966784  ;;  %s3200_s19 = scalar_lea.vmem [#allocation8], %s3192_s8  ;;  %s493_s21 = scalar_lea.sflag [#allocation10], %s474_s15 }
  0xae   : > { %s496_s25 = scalar_lea.vmem [#allocation9], %s3192_s8 }
  0xaf   : > { %2839 = dma.done.wait (%p3573_p6), %s493_s21, 512  }
  0xb0   : > { %2841 = vsyncadd (%p3573_p6), %s493_s21, 4294966784  ;;  %p566_p3 = scmp.lt.s32.totalorder %s3074_s14, 1  ;;  %s3574_s24 = sld [smem:[#allocation22_spill]] }
  0xb1   : > { %s505_s10 = scalar_lea.vmem [#allocation11], %s3192_s8  ;;  %p3575_p4 = scmp.ne.s32.totalorder %s3074_s14, 0 }
  0xb2   : > { %s3209_s9 = scalar_select %p566_p3, %s3074_s14, 1 }
  0xb3   : > { %582 = sbr.rel (%p3575_p4) target bundleno = 186 (0xba), region = 88  ;;  %v583_v0 = vld [vmem:[#allocation3] sm:$0xff] (!%p3575_p4)  ;;  %vm585_vm0 = vcmask (!%p3575_p4), 261120   ;;  %v584_v1 = vld [vmem:[#allocation3 + $0x8] sm:$0xff] (!%p3575_p4) }
  0xb4   : > { %s568_s20 = scalar_lea.vmem %s3526_s5, %s3209_s9  ;;  %s571_s16 = scalar_lea.vmem %s3527_s6, %s3209_s9  ;;  %586 = vst.msk [vmem:[#allocation2] sm:$0xff] (!%p3575_p4), %vm585_vm0, %v583_v0  ;;  %587 = vst.msk [vmem:[#allocation2 + $0x8] sm:$0xff] (!%p3575_p4), %vm585_vm0, %v584_v1 }
  0xb5   : > { %s574_s22 = scalar_lea.vmem %s3528_s7, %s3209_s9 }
  0xb6   : > { %s577_s17 = scalar_lea.vmem %s3574_s24, %s3209_s9 }
  0xba PF: > { %vm592_vm1 = vcmask 261120   ;;  %v2578_v16 = vld [vmem:[%s478_s3] sm:$0xff]   ;;  %v2871_v17 = vmov 0.0   ;;  %vm2872_vm2 = vmmov 0   ;;  %v2579_v18 = vld [vmem:[%s478_s3 + $0x8] sm:$0xff]   ;;  %s2873_s21 = smov 96  }
  0xbb   : > { %v588_v2 = vld [vmem:[#allocation2] sm:$0xff]  ;;  %v589_v3 = vld [vmem:[#allocation2 + $0x8] sm:$0xff]  ;;  %2343 = vmatprep.subr.bf16.mxu0 %v2871_v17  ;;  %2347 = vmatprep.mubr.msk.bf16.mxu0 %vm2872_vm2, %v2871_v17  ;;  %vm719_vm7 = vcmask 64512   ;;  %s2874_s30 = smov 64   ;;  %s2875_s26 = smov 88   ;;  %vm843_vm8 = vcmask 1043456  }
  0xbc   : > { %v593_v4 = vsel %vm592_vm1, %v588_v2, 0.0  ;;  %v596_v5 = vsel %vm592_vm1, %v589_v3, 0.0  ;;  %2344 = vmatpush3.bf16.msra.mxu0 %v2578_v16  ;;  %2351 = vmatprep.subr.bf16.mxu1 %v2871_v17  ;;  %v2243_v35 = vld [vmem:[%s568_s20] ss:$0 sm:$0xff]  ;;  %s2876_s20 = smov 120   ;;  %s2877_s1 = smov 56  }
  0xbd   : > { %594 = vadd.xlane.f32.xlu0 %v593_v4  ;;  %2345 = vmatprep.subr.bf16.mxu0 %v2871_v17  ;;  %v2244_v41 = vld [vmem:[%s571_s16] ss:$0 sm:$0xff]  ;;  %s2878_s12 = smov 80   ;;  %s2879_s16 = smov 112  }
  0xbe   : > { %2353 = vmatprep.mubr.msk.bf16.mxu1 %vm2872_vm2, %v2871_v17  ;;  %s2880_s13 = smov 48   ;;  %s2881_s29 = smov 72  }
  0xbf   : > { %s2882_s28 = smov 104   ;;  %s2883_s27 = smov 40  }
  0xc0   : > { %2346 = vmatpush3.bf16.msra.mxu0 %v2579_v18  ;;  %p2281_p11 = scmp.ne.s32.totalorder %s3074_s14, 1 }
  0xc1   : > { %597 = vadd.xlane.f32.xlu0 %v596_v5  ;;  %2357 = vmatprep.subr.bf16.mxu0 %v2871_v17  ;;  %s3578_s11 = sld [smem:[#allocation24_spill]] (!%p2281_p11) }
 0x14a   : > { %v595_v6 = vpop.xlane.xlu0 %594 }
 0x14b   : > { %v600_v7 = vmul.f32 0.03125, %v595_v6 }
 0x14d   : > { %v602_v8 = vsub.f32 %v588_v2, %v600_v7 }
 0x14e   : > { %v598_v9 = vpop.xlane.xlu0 %597 }
 0x14f   : > { %v601_v10 = vmul.f32 0.03125, %v598_v9  ;;  %v604_v11 = vmul.f32 %v602_v8, %v602_v8  ;;  %v634_v37 = vmul.f32 %v2243_v35, %v602_v8 }
 0x151   : > { %v603_v12 = vsub.f32 %v589_v3, %v601_v10  ;;  %v606_v13 = vsel %vm592_vm1, %v604_v11, 0.0 }
 0x152   : > { %607 = vadd.xlane.f32.xlu1 %v606_v13 }
 0x153   : > { %v605_v14 = vmul.f32 %v603_v12, %v603_v12  ;;  %v635_v38 = vmul.f32 %v2243_v35, %v603_v12 }
 0x155   : > { %v609_v15 = vsel %vm592_vm1, %v605_v14, 0.0 }
 0x156   : > { %610 = vadd.xlane.f32.xlu1 %v609_v15 }
 0x1df   : > { %v608_v19 = vpop.xlane.xlu1 %607 }
 0x1e0   : > { %v612_v20 = vmul.f32 0.032258064, %v608_v19 }
 0x1e2   : > { %2584 = vrsqrt.f32 %v612_v20  ;;  %vm616_vm3 = vcmp.eq.f32.partialorder %v612_v20, inf  ;;  %v619_v25 = vand.u32 2147483648, %v612_v20  ;;  %vm618_vm4 = vcmp.eq.f32.partialorder %v612_v20, 0.0 }
 0x1e3   : > { %v611_v21 = vpop.xlane.xlu1 %610 }
 0x1e4   : > { %v613_v22 = vmul.f32 0.032258064, %v611_v21 }
 0x1e6   : > { %2586 = vrsqrt.f32 %v613_v22  ;;  %vm623_vm5 = vcmp.eq.f32.partialorder %v613_v22, inf  ;;  %v626_v31 = vand.u32 2147483648, %v613_v22  ;;  %vm625_vm6 = vcmp.eq.f32.partialorder %v613_v22, 0.0 }
 0x1ec   : > { %v2585_v23 = vpop.eup %2584 }
 0x1ed   : > { %v615_v24 = vmul.f32 %v2585_v23, %v612_v20 }
 0x1ef   : > { %v617_v26 = vsel %vm616_vm3, %v612_v20, %v615_v24 }
 0x1f0   : > { %v2587_v27 = vpop.eup %2586  ;;  %v620_v28 = vsel %vm618_vm4, %v619_v25, %v617_v26 }
 0x1f1   : > { %v636_v29 = vadd.f32 1e-06, %v620_v28  ;;  %v622_v30 = vmul.f32 %v2587_v27, %v613_v22 }
 0x1f3   : > { %2588 = vrcp.f32 %v636_v29  ;;  %v624_v32 = vsel %vm623_vm5, %v613_v22, %v622_v30 }
 0x1f4   : > { %v627_v33 = vsel %vm625_vm6, %v626_v31, %v624_v32 }
 0x1f5   : > { %v637_v34 = vadd.f32 1e-06, %v627_v33 }
 0x1f7   : > { %2590 = vrcp.f32 %v637_v34 }
 0x1fd   : > { %v2589_v36 = vpop.eup %2588 }
 0x1fe   : > { %v639_v39 = vmul.f32 %v2589_v36, %v634_v37 }
 0x200   : > { %v3256_v43 = vadd.f32 %v2244_v41, %v639_v39 }
 0x201   : > { %v2591_v40 = vpop.eup %2590 }
 0x202   : > { %v641_v42 = vmul.f32 %v2591_v40, %v635_v38 }
 0x204   : > { %v3258_v44 = vadd.f32 %v2244_v41, %v641_v42 }
 0x206   : > { %v650_v45 = vpack.c.bf16 %v3258_v44, %v3256_v43 }
 0x208   : > { %2348 = vmatmul.mubr.msk.bf16.vlgmr.msra.gmra.mrb[0].mxu0 %vm592_vm1, %v650_v45 }
 0x209   : > { %2359 = vmatprep.mubr.msk.bf16.mxu0 %vm2872_vm2, %v2871_v17 }
 0x2db   : > { %v704_v46 = vpop.f32.mrb[0].mxu0 }
 0x2dc   : > { %v3265_v47 = vpack.c.bf16 %v704_v46, %v704_v46  ;;  %v2349_v48 = vpop.f32.mrb[1].mxu0 }
 0x2dd   : > { %v707_v49 = vpop.f32.mrb[2].mxu0 }
 0x2de   : > { %v3267_v50 = vpack.c.bf16 %v707_v49, %v707_v49  ;;  %717 = vrot.lane.b32.xlu0 %v3265_v47, %s2873_s21  ;;  %v2350_v51 = vpop.f32.mrb[3].mxu0 }
 0x2e0   : > { %766 = vrot.lane.b32.xlu1 %v3267_v50, %s2873_s21 }
 0x350   : > { %v718_v52 = vpop.permute.xlu0 %717 }
 0x351   : > { %v724_v53 = vsel %vm719_vm7, %v718_v52, 0 }
 0x352   : > { %2352 = vmatpush3.bf16.xpose.msra.mxu1 %v724_v53  ;;  %v767_v54 = vpop.permute.xlu1 %766 }
 0x353   : > { %v772_v55 = vsel %vm719_vm7, %v767_v54, 0  ;;  %2363 = vmatprep.subr.bf16.mxu1 %v2871_v17 }
 0x354   : > { %2358 = vmatpush3.bf16.xpose.msra.mxu0 %v772_v55 }
 0x355   : > { %2369 = vmatprep.subr.bf16.mxu0 %v2871_v17 }
 0x359   : > { %2354 = vmatmul.mubr.msk.bf16.vlgmr.msra.gmra.mrb[0].mxu1 %vm719_vm7, %v3265_v47 }
 0x35a   : > { %2365 = vmatprep.mubr.msk.bf16.mxu1 %vm2872_vm2, %v2871_v17 }
 0x35b   : > { %2360 = vmatmul.mubr.msk.bf16.vlgmr.msra.gmra.mrb[4].mxu0 %vm719_vm7, %v3267_v50 }
 0x35c   : > { %2371 = vmatprep.mubr.msk.bf16.mxu0 %vm2872_vm2, %v2871_v17 }
 0x42c   : > { %v760_v56 = vpop.f32.mrb[0].mxu1 }
 0x42d   : > { %v2355_v57 = vpop.f32.mrb[1].mxu1  ;;  %v814_v58 = vsel %vm719_vm7, %v760_v56, -inf }
 0x42e   : > { %v763_v59 = vpop.f32.mrb[2].mxu1  ;;  %815 = vmax.xlane.f32.xlu1 %v814_v58  ;;  %v808_v60 = vpop.f32.mrb[4].mxu0 }
 0x42f   : > { %v2356_v61 = vpop.f32.mrb[3].mxu1  ;;  %v2361_v62 = vpop.f32.mrb[5].mxu0  ;;  %v817_v63 = vsel %vm719_vm7, %v808_v60, -inf }
 0x430   : > { %818 = vmax.xlane.f32.xlu0 %v817_v63  ;;  %v811_v0 = vpop.f32.mrb[6].mxu0 }
 0x431   : > { %v2362_v1 = vpop.f32.mrb[7].mxu0 }
 0x43f   : > { %887 = vrot.lane.b32.xlu1 %v3267_v50, %s2874_s30 }
 0x443   : > { %939 = vrot.lane.b32.xlu1 %v3265_v47, %s2875_s26 }
 0x4bb   : > { %v816_v2 = vpop.xlane.xlu1 %815 }
 0x4bc   : > { %v820_v3 = vsub.f32 %v760_v56, %v816_v2 }
 0x4bd   : > { %v819_v4 = vpop.xlane.xlu0 %818 }
 0x4be   : > { %v822_v5 = vmul.f32 1.442695, %v820_v3  ;;  %v821_v6 = vsub.f32 %v808_v60, %v819_v4 }
 0x4bf   : > { %v888_v7 = vpop.permute.xlu1 %887 }
 0x4c0   : > { %2592 = vpow2.f32 %v822_v5  ;;  %v824_v8 = vmul.f32 1.442695, %v821_v6  ;;  %v893_v9 = vsel %vm843_vm8, %v888_v7, 0  ;;  %v2258_v7 = vld [vmem:[%s3200_s19 + $0x4] sm:$0xf] }
 0x4c1   : > { %2370 = vmatpush3.bf16.msra.mxu0 %v893_v9 }
 0x4c2   : > { %2594 = vpow2.f32 %v824_v8  ;;  %2381 = vmatprep.subr.bf16.mxu0 %v2871_v17 }
 0x4c3   : > { %v940_v14 = vpop.permute.xlu1 %939 }
 0x4c4   : > { %v945_v26 = vsel %vm719_vm7, %v940_v14, 0 }
 0x4ca   : > { %v2593_v10 = vpop.eup %2592 }
 0x4cb   : > { %v826_v11 = vsel %vm719_vm7, %v2593_v10, 0.0 }
 0x4cc   : > { %v2595_v12 = vpop.eup %2594  ;;  %827 = vadd.xlane.f32.xlu0 %v826_v11 }
 0x4cd   : > { %v829_v13 = vsel %vm719_vm7, %v2595_v12, 0.0 }
 0x4ce   : > { %830 = vadd.xlane.f32.xlu1 %v829_v13 }
 0x4df   : > { %989 = vrot.lane.b32.xlu1 %v3267_v50, %s2875_s26 }
 0x4e2   : > { %838 = vrot.lane.b32.xlu0 %v3265_v47, %s2874_s30 }
 0x4e3   : > { %987 = vrot.lane.b32.xlu1 %v3267_v50, %s2876_s20 }
 0x4e6   : > { %937 = vrot.lane.b32.xlu0 %v3265_v47, %s2876_s20 }
 0x559   : > { %v828_v15 = vpop.xlane.xlu0 %827 }
 0x55a   : > { %2596 = vrcp.f32 %v828_v15 }
 0x55b   : > { %v831_v16 = vpop.xlane.xlu1 %830 }
 0x55c   : > { %2598 = vrcp.f32 %v831_v16 }
 0x55d   : > { %v839_v18 = vpop.permute.xlu0 %838 }
 0x55e   : > { %v845_v19 = vsel %vm843_vm8, %v839_v18, 0 }
 0x55f   : > { %2364 = vmatpush3.bf16.msra.mxu1 %v845_v19  ;;  %v990_v25 = vpop.permute.xlu1 %989 }
 0x560   : > { %2375 = vmatprep.subr.bf16.mxu1 %v2871_v17  ;;  %v995_v28 = vsel %vm719_vm7, %v990_v25, 0 }
 0x561   : > { %v938_v29 = vpop.permute.xlu0 %937 }
 0x563   : > { %v988_v30 = vpop.permute.xlu1 %987 }
 0x564   : > { %v2597_v20 = vpop.eup %2596 }
 0x565   : > { %v834_v21 = vmul.f32 %v2597_v20, %v2593_v10  ;;  %v1164_v10 = vsel %vm843_vm8, %v2258_v7, 0 }
 0x566   : > { %v2599_v22 = vpop.eup %2598 }
 0x567   : > { %v835_v23 = vmul.f32 %v2599_v22, %v2595_v12  ;;  %v836_v24 = vpack.c.bf16 %v834_v21, %v834_v21  ;;  %v936_v12 = vld [vmem:[%s3200_s19] sm:$0xf] }
 0x568   : > { %v1211_v15 = vsel %vm843_vm8, %v936_v12, 0 }
 0x569   : > { %2366 = vmatmul.mubr.msk.bf16.vlgmr.msra.gmra.mrb[4].mxu1 %vm719_vm7, %v836_v24  ;;  %v837_v27 = vpack.c.bf16 %v835_v23, %v835_v23 }
 0x56a   : > { %2376 = vmatpush3.bf16.xpose.msra.mxu1 %v945_v26  ;;  %2377 = vmatprep.mubr.msk.bf16.mxu1 %vm2872_vm2, %v2871_v17 }
 0x56b   : > { %2372 = vmatmul.mubr.msk.bf16.vlgmr.msra.gmra.mrb[8].mxu0 %vm719_vm7, %v837_v27  ;;  %2387 = vmatprep.subr.bf16.mxu1 %v2871_v17 }
 0x56c   : > { %2382 = vmatpush3.bf16.xpose.msra.mxu0 %v995_v28  ;;  %2383 = vmatprep.mubr.msk.bf16.mxu0 %vm2872_vm2, %v2871_v17 }
 0x56d   : > { %2393 = vmatprep.subr.bf16.mxu0 %v2871_v17 }
 0x571   : > { %2378 = vmatmul.mubr.msk.bf16.vlgmr.msra.gmra.mrb[8].mxu1 %vm719_vm7, %v938_v29 }
 0x572   : > { %2389 = vmatprep.mubr.msk.bf16.mxu1 %vm2872_vm2, %v2871_v17 }
 0x573   : > { %2384 = vmatmul.mubr.msk.bf16.vlgmr.msra.gmra.mrb[12].mxu0 %vm719_vm7, %v988_v30 }
 0x574   : > { %2395 = vmatprep.mubr.msk.bf16.mxu0 %vm2872_vm2, %v2871_v17 }
 0x63c   : > { %v3313_v31 = vpop.f32.mrb[4].mxu1 }
 0x63d   : > { %v2367_v32 = vpop.f32.mrb[5].mxu1 }
 0x63e   : > { %v884_v33 = vpop.f32.mrb[6].mxu1  ;;  %v3315_v34 = vpop.f32.mrb[8].mxu0 }
 0x63f   : > { %v935_v35 = vpack.c.bf16 %v3315_v34, %v3313_v31  ;;  %v2368_v36 = vpop.f32.mrb[7].mxu1  ;;  %v2373_v37 = vpop.f32.mrb[9].mxu0 }
 0x640   : > { %v932_v38 = vpop.f32.mrb[10].mxu0 }
 0x641   : > { %v2374_v39 = vpop.f32.mrb[11].mxu0 }
 0x644   : > { %v981_v40 = vpop.f32.mrb[8].mxu1 }
 0x645   : > { %v2379_v41 = vpop.f32.mrb[9].mxu1  ;;  %v1037_v42 = vsel %vm719_vm7, %v981_v40, -inf }
 0x646   : > { %1038 = vmax.xlane.f32.xlu0 %v1037_v42  ;;  %v984_v45 = vpop.f32.mrb[10].mxu1  ;;  %v1031_v46 = vpop.f32.mrb[12].mxu0 }
 0x647   : > { %v2380_v48 = vpop.f32.mrb[11].mxu1  ;;  %v2385_v49 = vpop.f32.mrb[13].mxu0  ;;  %v1040_v51 = vsel %vm719_vm7, %v1031_v46, -inf }
 0x648   : > { %1041 = vmax.xlane.f32.xlu1 %v1040_v51  ;;  %v1034_v52 = vpop.f32.mrb[14].mxu0 }
 0x649   : > { %v2386_v53 = vpop.f32.mrb[15].mxu0 }
 0x659   : > { %1109 = vrot.lane.b32.xlu1 %v3267_v50, %s2877_s1 }
 0x65d   : > { %1256 = vrot.lane.b32.xlu1 %v3265_v47, %s2878_s12 }
 0x661   : > { %1306 = vrot.lane.b32.xlu1 %v3267_v50, %s2878_s12 }
 0x665   : > { %1304 = vrot.lane.b32.xlu1 %v3267_v50, %s2879_s16 }
 0x6d3   : > { %v1039_v54 = vpop.xlane.xlu0 %1038 }
 0x6d4   : > { %v1043_v55 = vsub.f32 %v981_v40, %v1039_v54 }
 0x6d5   : > { %v1042_v56 = vpop.xlane.xlu1 %1041 }
 0x6d6   : > { %v1045_v57 = vmul.f32 1.442695, %v1043_v55  ;;  %v1044_v58 = vsub.f32 %v1031_v46, %v1042_v56 }
 0x6d8   : > { %2600 = vpow2.f32 %v1045_v57  ;;  %v1047_v59 = vmul.f32 1.442695, %v1044_v58 }
 0x6d9   : > { %v1110_v60 = vpop.permute.xlu1 %1109 }
 0x6da   : > { %2602 = vpow2.f32 %v1047_v59  ;;  %v1115_v61 = vsel %vm843_vm8, %v1110_v60, 0 }
 0x6db   : > { %2394 = vmatpush3.bf16.msra.mxu0 %v1115_v61 }
 0x6dc   : > { %2405 = vmatprep.subr.bf16.mxu0 %v2871_v17 }
 0x6dd   : > { %v1257_v16 = vpop.permute.xlu1 %1256 }
 0x6de   : > { %v1262_v29 = vsel %vm719_vm7, %v1257_v16, 0 }
 0x6e1   : > { %v1307_v18 = vpop.permute.xlu1 %1306 }
 0x6e2   : > { %v2601_v62 = vpop.eup %2600  ;;  %v1312_v19 = vsel %vm719_vm7, %v1307_v18, 0 }
 0x6e3   : > { %v1049_v63 = vsel %vm719_vm7, %v2601_v62, 0.0 }
 0x6e4   : > { %v2603_v0 = vpop.eup %2602  ;;  %1050 = vadd.xlane.f32.xlu0 %v1049_v63 }
 0x6e5   : > { %v1052_v1 = vsel %vm719_vm7, %v2603_v0, 0.0  ;;  %v1305_v20 = vpop.permute.xlu1 %1304 }
 0x6e8   : > { %1053 = vadd.xlane.f32.xlu0 %v1052_v1 }
 0x6fe   : > { %1061 = vrot.lane.b32.xlu0 %v3265_v47, %s2877_s1 }
 0x702   : > { %1254 = vrot.lane.b32.xlu0 %v3265_v47, %s2879_s16 }
 0x771   : > { %v1051_v2 = vpop.xlane.xlu0 %1050 }
 0x772   : > { %2604 = vrcp.f32 %v1051_v2 }
 0x775   : > { %v1054_v3 = vpop.xlane.xlu0 %1053 }
 0x776   : > { %2606 = vrcp.f32 %v1054_v3 }
 0x779   : > { %v1062_v4 = vpop.permute.xlu0 %1061 }
 0x77a   : > { %v1067_v5 = vsel %vm843_vm8, %v1062_v4, 0 }
 0x77b   : > { %2388 = vmatpush3.bf16.msra.mxu1 %v1067_v5 }
 0x77c   : > { %v2605_v6 = vpop.eup %2604  ;;  %2399 = vmatprep.subr.bf16.mxu1 %v2871_v17 }
 0x77d   : > { %v1057_v8 = vmul.f32 %v2605_v6, %v2601_v62  ;;  %v1255_v33 = vpop.permute.xlu0 %1254 }
 0x77f   : > { %v1059_v9 = vpack.c.bf16 %v1057_v8, %v1057_v8 }
 0x780   : > { %v2607_v11 = vpop.eup %2606 }
 0x781   : > { %v1058_v13 = vmul.f32 %v2607_v11, %v2603_v0  ;;  %2390 = vmatmul.mubr.msk.bf16.vlgmr.msra.gmra.mrb[12].mxu1 %vm719_vm7, %v1059_v9 }
 0x782   : > { %2400 = vmatpush3.bf16.msra.mxu1 %v1164_v10  ;;  %2401 = vmatprep.mubr.msk.bf16.mxu1 %vm2872_vm2, %v2871_v17 }
 0x783   : > { %v1060_v14 = vpack.c.bf16 %v1058_v13, %v1058_v13  ;;  %2411 = vmatprep.subr.bf16.mxu1 %v2871_v17 }
 0x785   : > { %2396 = vmatmul.mubr.msk.bf16.vlgmr.msra.gmra.mrb[16].mxu0 %vm719_vm7, %v1060_v14 }
 0x786   : > { %2406 = vmatpush3.bf16.msra.mxu0 %v1211_v15  ;;  %2407 = vmatprep.mubr.msk.bf16.mxu0 %vm2872_vm2, %v2871_v17 }
 0x787   : > { %2417 = vmatprep.subr.bf16.mxu0 %v2871_v17 }
 0x78d   : > { %2408 = vmatmul.mubr.msk.bf16.vlgmr.msra.gmra.mrb[20].mxu0 %vm719_vm7, %v935_v35 }
 0x78e   : > { %2419 = vmatprep.mubr.msk.bf16.mxu0 %vm2872_vm2, %v2871_v17 }
 0x78f   : > { %2418 = vmatpush3.bf16.xpose.msra.mxu0 %v1312_v19 }
 0x790   : > { %2429 = vmatprep.subr.bf16.mxu0 %v2871_v17 }
 0x796   : > { %2420 = vmatmul.mubr.msk.bf16.vlgmr.msra.gmra.mrb[24].mxu0 %vm719_vm7, %v1305_v20 }
 0x797   : > { %2431 = vmatprep.mubr.msk.bf16.mxu0 %vm2872_vm2, %v2871_v17 }
 0x854   : > { %v1103_v21 = vpop.f32.mrb[12].mxu1 }
 0x855   : > { %v2391_v22 = vpop.f32.mrb[13].mxu1 }
 0x856   : > { %v1106_v23 = vpop.f32.mrb[14].mxu1  ;;  %v2265_v22 = vld [vmem:[%s3200_s19 + $0x8] sm:$0xf] }
 0x857   : > { %v2392_v24 = vpop.f32.mrb[15].mxu1  ;;  %v1481_v23 = vsel %vm843_vm8, %v2265_v22, 0 }
 0x858   : > { %v1151_v25 = vpop.f32.mrb[16].mxu0 }
 0x859   : > { %v1157_v26 = vpack.c.bf16 %v1151_v25, %v1103_v21  ;;  %v2397_v27 = vpop.f32.mrb[17].mxu0 }
 0x85a   : > { %v1154_v28 = vpop.f32.mrb[18].mxu0 }
 0x85b   : > { %v2398_v30 = vpop.f32.mrb[19].mxu0  ;;  %2402 = vmatmul.mubr.msk.bf16.vlgmr.msra.gmra.mrb[16].mxu1 %vm719_vm7, %v1157_v26 }
 0x85c   : > { %2412 = vmatpush3.bf16.xpose.msra.mxu1 %v1262_v29  ;;  %2413 = vmatprep.mubr.msk.bf16.mxu1 %vm2872_vm2, %v2871_v17 }
 0x85d   : > { %2423 = vmatprep.subr.bf16.mxu1 %v2871_v17 }
 0x860   : > { %v1247_v31 = vpop.f32.mrb[20].mxu0 }
 0x861   : > { %v2409_v32 = vpop.f32.mrb[21].mxu0 }
 0x862   : > { %v1250_v34 = vpop.f32.mrb[22].mxu0 }
 0x863   : > { %v2410_v35 = vpop.f32.mrb[23].mxu0  ;;  %2414 = vmatmul.mubr.msk.bf16.vlgmr.msra.gmra.mrb[20].mxu1 %vm719_vm7, %v1255_v33 }
 0x864   : > { %2425 = vmatprep.mubr.msk.bf16.mxu1 %vm2872_vm2, %v2871_v17 }
 0x869   : > { %v1348_v36 = vpop.f32.mrb[24].mxu0 }
 0x86a   : > { %v2421_v37 = vpop.f32.mrb[25].mxu0  ;;  %v1357_v38 = vsel %vm719_vm7, %v1348_v36, -inf }
 0x86b   : > { %1358 = vmax.xlane.f32.xlu1 %v1357_v38  ;;  %v1351_v39 = vpop.f32.mrb[26].mxu0 }
 0x86c   : > { %v2422_v40 = vpop.f32.mrb[27].mxu0 }
 0x87c   : > { %1426 = vrot.lane.b32.xlu1 %v3267_v50, %s2880_s13 }
 0x880   : > { %1528 = vrot.lane.b32.xlu1 %v3265_v47, %s2881_s29 }
 0x884   : > { %1578 = vrot.lane.b32.xlu1 %v3267_v50, %s2881_s29 }
 0x888   : > { %1576 = vrot.lane.b32.xlu1 %v3267_v50, %s2882_s28 }
 0x8f8   : > { %v1359_v41 = vpop.xlane.xlu1 %1358 }
 0x8f9   : > { %v1361_v46 = vsub.f32 %v1348_v36, %v1359_v41 }
 0x8fb   : > { %v1364_v48 = vmul.f32 1.442695, %v1361_v46 }
 0x8fc   : > { %v1427_v42 = vpop.permute.xlu1 %1426 }
 0x8fd   : > { %v1432_v45 = vsel %vm843_vm8, %v1427_v42, 0  ;;  %2608 = vpow2.f32 %v1364_v48 }
 0x8fe   : > { %2430 = vmatpush3.bf16.msra.mxu0 %v1432_v45 }
 0x8ff   : > { %2441 = vmatprep.subr.bf16.mxu0 %v2871_v17 }
 0x900   : > { %v1529_v7 = vpop.permute.xlu1 %1528 }
 0x901   : > { %v1534_v9 = vsel %vm719_vm7, %v1529_v7, 0 }
 0x904   : > { %v1579_v29 = vpop.permute.xlu1 %1578 }
 0x907   : > { %v2609_v59 = vpop.eup %2608 }
 0x908   : > { %v1369_v62 = vsel %vm719_vm7, %v2609_v59, 0.0  ;;  %v1577_v36 = vpop.permute.xlu1 %1576 }
 0x92e   : > { %v1200_v49 = vpop.f32.mrb[16].mxu1 }
 0x92f   : > { %v3373_v51 = vadd.f32 %v1247_v31, %v1200_v49  ;;  %v2403_v52 = vpop.f32.mrb[17].mxu1 }
 0x930   : > { %v1203_v53 = vpop.f32.mrb[18].mxu1 }
 0x931   : > { %v3375_v54 = vadd.f32 %v1250_v34, %v1203_v53  ;;  %v2404_v55 = vpop.f32.mrb[19].mxu1  ;;  %v1584_v34 = vsel %vm719_vm7, %v1579_v29, 0 }
 0x936   : > { %v1298_v56 = vpop.f32.mrb[20].mxu1 }
 0x937   : > { %v2415_v57 = vpop.f32.mrb[21].mxu1  ;;  %v1354_v58 = vsel %vm719_vm7, %v1298_v56, -inf }
 0x938   : > { %1355 = vmax.xlane.f32.xlu0 %v1354_v58  ;;  %v1301_v60 = vpop.f32.mrb[22].mxu1 }
 0x939   : > { %v2416_v61 = vpop.f32.mrb[23].mxu1 }
 0x93c   : > { %1370 = vadd.xlane.f32.xlu0 %v1369_v62 }
 0x9c5   : > { %v1356_v63 = vpop.xlane.xlu0 %1355 }
 0x9c6   : > { %v1360_v0 = vsub.f32 %v1298_v56, %v1356_v63 }
 0x9c8   : > { %v1362_v1 = vmul.f32 1.442695, %v1360_v0 }
 0x9c9   : > { %v1371_v2 = vpop.xlane.xlu0 %1370 }
 0x9ca   : > { %2610 = vpow2.f32 %v1362_v1 }
 0x9cb   : > { %2612 = vrcp.f32 %v1371_v2 }
 0x9d4   : > { %v2611_v3 = vpop.eup %2610 }
 0x9d5   : > { %v2613_v4 = vpop.eup %2612  ;;  %v1366_v5 = vsel %vm719_vm7, %v2611_v3, 0.0 }
 0x9d6   : > { %v1375_v6 = vmul.f32 %v2613_v4, %v2609_v59  ;;  %1367 = vadd.xlane.f32.xlu0 %v1366_v5 }
 0x9d8   : > { %v1377_v8 = vpack.c.bf16 %v1375_v6, %v1375_v6 }
 0x9da   : > { %2432 = vmatmul.mubr.msk.bf16.vlgmr.msra.gmra.mrb[28].mxu0 %vm719_vm7, %v1377_v8  ;;  %v2271_v8 = vld [vmem:[%s3200_s19 + $0xc] sm:$0xf] }
 0x9db   : > { %2442 = vmatpush3.bf16.xpose.msra.mxu0 %v1534_v9  ;;  %2443 = vmatprep.mubr.msk.bf16.mxu0 %vm2872_vm2, %v2871_v17  ;;  %v1753_v9 = vsel %vm843_vm8, %v2271_v8, 0 }
 0x9dc   : > { %2453 = vmatprep.subr.bf16.mxu0 %v2871_v17 }
 0x9ec   : > { %1378 = vrot.lane.b32.xlu0 %v3265_v47, %s2880_s13 }
 0x9f0   : > { %1526 = vrot.lane.b32.xlu0 %v3265_v47, %s2882_s28 }
 0xa63   : > { %v1368_v10 = vpop.xlane.xlu0 %1367 }
 0xa64   : > { %2614 = vrcp.f32 %v1368_v10 }
 0xa67   : > { %v1379_v11 = vpop.permute.xlu0 %1378 }
 0xa68   : > { %v1384_v12 = vsel %vm843_vm8, %v1379_v11, 0 }
 0xa69   : > { %2424 = vmatpush3.bf16.msra.mxu1 %v1384_v12 }
 0xa6a   : > { %2435 = vmatprep.subr.bf16.mxu1 %v2871_v17 }
 0xa6b   : > { %v1527_v13 = vpop.permute.xlu0 %1526 }
 0xa6c   : > { %2444 = vmatmul.mubr.msk.bf16.vlgmr.msra.gmra.mrb[32].mxu0 %vm719_vm7, %v1527_v13 }
 0xa6d   : > { %2455 = vmatprep.mubr.msk.bf16.mxu0 %vm2872_vm2, %v2871_v17 }
 0xa6e   : > { %v2615_v14 = vpop.eup %2614 }
 0xa6f   : > { %v1374_v15 = vmul.f32 %v2615_v14, %v2611_v3 }
 0xa71   : > { %v1376_v16 = vpack.c.bf16 %v1374_v15, %v1374_v15 }
 0xa73   : > { %2426 = vmatmul.mubr.msk.bf16.vlgmr.msra.gmra.mrb[24].mxu1 %vm719_vm7, %v1376_v16 }
 0xa74   : > { %2437 = vmatprep.mubr.msk.bf16.mxu1 %vm2872_vm2, %v2871_v17  ;;  %2436 = vmatpush3.bf16.msra.mxu1 %v1481_v23 }
 0xa75   : > { %2447 = vmatprep.subr.bf16.mxu1 %v2871_v17 }
 0xaad   : > { %v1468_v18 = vpop.f32.mrb[28].mxu0 }
 0xaae   : > { %v2433_v19 = vpop.f32.mrb[29].mxu0 }
 0xaaf   : > { %v1471_v20 = vpop.f32.mrb[30].mxu0 }
 0xab0   : > { %v2434_v21 = vpop.f32.mrb[31].mxu0 }
 0xb3f   : > { %v1570_v24 = vpop.f32.mrb[32].mxu0 }
 0xb40   : > { %v2445_v25 = vpop.f32.mrb[33].mxu0  ;;  %v1626_v26 = vsel %vm719_vm7, %v1570_v24, -inf }
 0xb41   : > { %1627 = vmax.xlane.f32.xlu0 %v1626_v26  ;;  %v1573_v27 = vpop.f32.mrb[34].mxu0 }
 0xb42   : > { %v2446_v28 = vpop.f32.mrb[35].mxu0 }
 0xb46   : > { %v1420_v30 = vpop.f32.mrb[24].mxu1 }
 0xb47   : > { %v1474_v31 = vpack.c.bf16 %v1468_v18, %v1420_v30  ;;  %v2427_v32 = vpop.f32.mrb[25].mxu1 }
 0xb48   : > { %v1423_v33 = vpop.f32.mrb[26].mxu1 }
 0xb49   : > { %v2428_v35 = vpop.f32.mrb[27].mxu1  ;;  %2438 = vmatmul.mubr.msk.bf16.vlgmr.msra.gmra.mrb[28].mxu1 %vm719_vm7, %v1474_v31 }
 0xb4a   : > { %2448 = vmatpush3.bf16.xpose.msra.mxu1 %v1584_v34  ;;  %2449 = vmatprep.mubr.msk.bf16.mxu1 %vm2872_vm2, %v2871_v17 }
 0xb4b   : > { %2459 = vmatprep.subr.bf16.mxu1 %v2871_v17 }
 0xb51   : > { %2450 = vmatmul.mubr.msk.bf16.vlgmr.msra.gmra.mrb[32].mxu1 %vm719_vm7, %v1577_v36 }
 0xb52   : > { %2461 = vmatprep.mubr.msk.bf16.mxu1 %vm2872_vm2, %v2871_v17 }
 0xbce   : > { %v1628_v37 = vpop.xlane.xlu0 %1627 }
 0xbcf   : > { %v1632_v38 = vsub.f32 %v1570_v24, %v1628_v37 }
 0xbd1   : > { %v1634_v39 = vmul.f32 1.442695, %v1632_v38  ;;  %v2580_v38 = vld [vmem:[%s496_s25] sm:$0xff]  }
 0xbd3   : > { %2616 = vpow2.f32 %v1634_v39  ;;  %v2581_v39 = vld [vmem:[%s496_s25 + $0x8] sm:$0xff]  }
 0xbdd   : > { %v2617_v40 = vpop.eup %2616 }
 0xbde   : > { %v1638_v41 = vsel %vm719_vm7, %v2617_v40, 0.0 }
 0xbdf   : > { %1639 = vadd.xlane.f32.xlu0 %v1638_v41 }
 0xc1c   : > { %v1517_v42 = vpop.f32.mrb[28].mxu1 }
 0xc1d   : > { %v1524_v45 = vadd.f32 %v1517_v42, %v3373_v51  ;;  %v2439_v46 = vpop.f32.mrb[29].mxu1 }
 0xc1e   : > { %v1520_v48 = vpop.f32.mrb[30].mxu1 }
 0xc1f   : > { %v1525_v49 = vadd.f32 %v1520_v48, %v3375_v54  ;;  %v2440_v52 = vpop.f32.mrb[31].mxu1 }
 0xc24   : > { %v1620_v53 = vpop.f32.mrb[32].mxu1 }
 0xc25   : > { %v2451_v55 = vpop.f32.mrb[33].mxu1  ;;  %v1629_v56 = vsel %vm719_vm7, %v1620_v53, -inf }
 0xc26   : > { %1630 = vmax.xlane.f32.xlu1 %v1629_v56  ;;  %v1623_v57 = vpop.f32.mrb[34].mxu1 }
 0xc27   : > { %v2452_v58 = vpop.f32.mrb[35].mxu1 }
 0xc37   : > { %1698 = vrot.lane.b32.xlu1 %v3267_v50, %s2883_s27 }
 0xc6c   : > { %v1640_v0 = vpop.xlane.xlu0 %1639 }
 0xcb3   : > { %v1631_v59 = vpop.xlane.xlu1 %1630 }
 0xcb4   : > { %v1633_v60 = vsub.f32 %v1620_v53, %v1631_v59 }
 0xcb6   : > { %v1636_v61 = vmul.f32 1.442695, %v1633_v60 }
 0xcb7   : > { %v1699_v62 = vpop.permute.xlu1 %1698 }
 0xcb8   : > { %2618 = vpow2.f32 %v1636_v61  ;;  %v1704_v51 = vsel %vm843_vm8, %v1699_v62, 0  ;;  %v2273_v62 = vld [vmem:[%s574_s22] ss:$0 sm:$0xff]  ;;  %s3577_s22 = sld [smem:[#allocation23_spill]] (!%p2281_p11) }
 0xcb9   : > { %2460 = vmatpush3.bf16.msra.mxu1 %v1704_v51  ;;  %2620 = vrcp.f32 %v1640_v0 }
 0xcba   : > { %2471 = vmatprep.subr.bf16.mxu1 %v2871_v17 }
 0xcc2   : > { %v2619_v54 = vpop.eup %2618 }
 0xcc3   : > { %v1641_v63 = vsel %vm719_vm7, %v2619_v54, 0.0  ;;  %v2621_v1 = vpop.eup %2620 }
 0xcc4   : > { %1642 = vadd.xlane.f32.xlu0 %v1641_v63  ;;  %v1646_v2 = vmul.f32 %v2621_v1, %v2617_v40  ;;  %v2582_v40 = vld [vmem:[%s505_s10] sm:$0xff]  }
 0xcc6   : > { %v1648_v5 = vpack.c.bf16 %v1646_v2, %v1646_v2 }
 0xcda   : > { %1650 = vrot.lane.b32.xlu0 %v3265_v47, %s2883_s27 }
 0xd51   : > { %v1643_v50 = vpop.xlane.xlu0 %1642 }
 0xd52   : > { %2622 = vrcp.f32 %v1643_v50  ;;  %v2274_v50 = vld [vmem:[%s577_s17] ss:$0 sm:$0xff] }
 0xd55   : > { %v1651_v3 = vpop.permute.xlu0 %1650 }
 0xd56   : > { %v1656_v4 = vsel %vm843_vm8, %v1651_v3, 0 }
 0xd57   : > { %2454 = vmatpush3.bf16.msra.mxu0 %v1656_v4 }
 0xd58   : > { %2465 = vmatprep.subr.bf16.mxu0 %v2871_v17 }
 0xd5a   : > { %2456 = vmatmul.mubr.msk.bf16.vlgmr.msra.gmra.mrb[36].mxu0 %vm719_vm7, %v1648_v5 }
 0xd5b   : > { %2467 = vmatprep.mubr.msk.bf16.mxu0 %vm2872_vm2, %v2871_v17  ;;  %2466 = vmatpush3.bf16.msra.mxu0 %v1753_v9 }
 0xd5c   : > { %v2623_v47 = vpop.eup %2622  ;;  %2479 = vmatprep.subr.bf16.mxu0 %v2871_v17 }
 0xd5d   : > { %v1647_v6 = vmul.f32 %v2623_v47, %v2619_v54  ;;  %v2583_v47 = vld [vmem:[%s505_s10 + $0x8] sm:$0xff]  }
 0xd5f   : > { %v1649_v7 = vpack.c.bf16 %v1647_v6, %v1647_v6 }
 0xd61   : > { %2462 = vmatmul.mubr.msk.bf16.vlgmr.msra.gmra.mrb[36].mxu1 %vm719_vm7, %v1649_v7 }
 0xd62   : > { %2475 = vmatprep.mubr.msk.bf16.mxu1 %vm2872_vm2, %v2871_v17  ;;  %2472 = vmatpush3.bf16.msra.mxu1 %v2580_v38 }
 0xd63   : > { %2473 = vmatprep.subr.bf16.mxu1 %v2871_v17 }
 0xd66   : > { %2474 = vmatpush3.bf16.msra.mxu1 %v2581_v39 }
 0xe2d   : > { %v1692_v10 = vpop.f32.mrb[36].mxu0 }
 0xe2e   : > { %v2457_v11 = vpop.f32.mrb[37].mxu0 }
 0xe2f   : > { %v1695_v12 = vpop.f32.mrb[38].mxu0 }
 0xe30   : > { %v2458_v13 = vpop.f32.mrb[39].mxu0 }
 0xe34   : > { %v1740_v14 = vpop.f32.mrb[36].mxu1 }
 0xe35   : > { %v1746_v15 = vpack.c.bf16 %v1740_v14, %v1692_v10  ;;  %v2463_v16 = vpop.f32.mrb[37].mxu1 }
 0xe36   : > { %v1743_v18 = vpop.f32.mrb[38].mxu1 }
 0xe37   : > { %v2464_v19 = vpop.f32.mrb[39].mxu1  ;;  %2468 = vmatmul.mubr.msk.bf16.vlgmr.msra.gmra.mrb[40].mxu0 %vm719_vm7, %v1746_v15 }
 0xe38   : > { %2483 = vmatprep.mubr.msk.bf16.mxu0 %vm2872_vm2, %v2871_v17  ;;  %2480 = vmatpush3.bf16.msra.mxu0 %v2582_v40 }
 0xe39   : > { %2481 = vmatprep.subr.bf16.mxu0 %v2871_v17 }
 0xe3c   : > { %2482 = vmatpush3.bf16.msra.mxu0 %v2583_v47 }
 0xf0a   : > { %v1789_v20 = vpop.f32.mrb[40].mxu0 }
 0xf0b   : > { %v1796_v21 = vadd.f32 %v1789_v20, %v1524_v45  ;;  %v2469_v22 = vpop.f32.mrb[41].mxu0 }
 0xf0c   : > { %v1792_v23 = vpop.f32.mrb[42].mxu0 }
 0xf0d   : > { %v3433_v24 = vadd.f32 %v1796_v21, %v3256_v43  ;;  %v1797_v25 = vadd.f32 %v1792_v23, %v1525_v49  ;;  %v2470_v26 = vpop.f32.mrb[43].mxu0 }
 0xf0f   : > { %v3436_v27 = vadd.f32 %v1797_v25, %v3258_v44  ;;  %v1802_v28 = vsel %vm592_vm1, %v3433_v24, 0.0 }
 0xf10   : > { %1803 = vadd.xlane.f32.xlu1 %v1802_v28 }
 0xf11   : > { %v1805_v29 = vsel %vm592_vm1, %v3436_v27, 0.0 }
 0xf12   : > { %1806 = vadd.xlane.f32.xlu0 %v1805_v29 }
 0xf9d   : > { %v1804_v30 = vpop.xlane.xlu1 %1803 }
 0xf9e   : > { %v1808_v31 = vmul.f32 0.03125, %v1804_v30 }
 0xf9f   : > { %v1807_v43 = vpop.xlane.xlu0 %1806 }
 0xfa0   : > { %v1810_v32 = vsub.f32 %v3433_v24, %v1808_v31  ;;  %v1809_v33 = vmul.f32 0.03125, %v1807_v43 }
 0xfa2   : > { %v1811_v44 = vsub.f32 %v3436_v27, %v1809_v33  ;;  %v1812_v34 = vmul.f32 %v1810_v32, %v1810_v32  ;;  %v1842_v54 = vmul.f32 %v2273_v62, %v1810_v32 }
 0xfa4   : > { %v1814_v35 = vsel %vm592_vm1, %v1812_v34, 0.0  ;;  %v1813_v36 = vmul.f32 %v1811_v44, %v1811_v44  ;;  %v1843_v63 = vmul.f32 %v2273_v62, %v1811_v44 }
 0xfa5   : > { %1815 = vadd.xlane.f32.xlu0 %v1814_v35 }
 0xfa6   : > { %v1817_v37 = vsel %vm592_vm1, %v1813_v36, 0.0 }
 0xfa7   : > { %1818 = vadd.xlane.f32.xlu1 %v1817_v37 }
0x1032   : > { %v1816_v41 = vpop.xlane.xlu0 %1815 }
0x1033   : > { %v1820_v42 = vmul.f32 0.032258064, %v1816_v41 }
0x1034   : > { %v1819_v45 = vpop.xlane.xlu1 %1818 }
0x1035   : > { %2624 = vrsqrt.f32 %v1820_v42  ;;  %v1821_v46 = vmul.f32 0.032258064, %v1819_v45  ;;  %vm1824_vm9 = vcmp.eq.f32.partialorder %v1820_v42, inf  ;;  %v1827_v52 = vand.u32 2147483648, %v1820_v42 }
0x1036   : > { %vm1826_vm10 = vcmp.eq.f32.partialorder %v1820_v42, 0.0 }
0x1037   : > { %2626 = vrsqrt.f32 %v1821_v46  ;;  %vm1831_vm11 = vcmp.eq.f32.partialorder %v1821_v46, inf  ;;  %v1834_v17 = vand.u32 2147483648, %v1821_v46  ;;  %vm1833_vm12 = vcmp.eq.f32.partialorder %v1821_v46, 0.0 }
0x103f   : > { %v2625_v48 = vpop.eup %2624 }
0x1040   : > { %v1823_v49 = vmul.f32 %v2625_v48, %v1820_v42 }
0x1041   : > { %v2627_v53 = vpop.eup %2626 }
0x1042   : > { %v1825_v55 = vsel %vm1824_vm9, %v1820_v42, %v1823_v49  ;;  %v1830_v57 = vmul.f32 %v2627_v53, %v1821_v46  ;;  %v2282_v49 = vld [vmem:[%s3577_s22] ss:$0 sm:$0xff] (!%p2281_p11) }
0x1043   : > { %v1828_v56 = vsel %vm1826_vm10, %v1827_v52, %v1825_v55  ;;  %v2283_v55 = vld [vmem:[%s3578_s11] ss:$0 sm:$0xff] (!%p2281_p11) }
0x1044   : > { %v1844_v58 = vadd.f32 1e-06, %v1828_v56  ;;  %v1832_v59 = vsel %vm1831_vm11, %v1821_v46, %v1830_v57 }
0x1045   : > { %v1835_v60 = vsel %vm1833_vm12, %v1834_v17, %v1832_v59 }
0x1046   : > { %2628 = vrcp.f32 %v1844_v58  ;;  %v1845_v61 = vadd.f32 1e-06, %v1835_v60 }
0x1048   : > { %2630 = vrcp.f32 %v1845_v61 }
0x1050   : > { %v2629_v51 = vpop.eup %2628 }
0x1051   : > { %v1847_v0 = vmul.f32 %v2629_v51, %v1842_v54 }
0x1052   : > { %v2631_v1 = vpop.eup %2630 }
0x1053   : > { %v1849_v2 = vmul.f32 %v2631_v1, %v1843_v63  ;;  %v1856_v3 = vadd.f32 %v2274_v50, %v1847_v0 }
0x1055   : > { %v1857_v4 = vadd.f32 %v2274_v50, %v1849_v2 }
0x1057   : > { %v1858_v5 = vpack.c.bf16 %v1857_v4, %v1856_v3 }
0x1059   : > { %2476 = vmatmul.mubr.msk.bf16.vlgmr.msra.gmra.mrb[40].mxu1 %vm592_vm1, %v1858_v5 }
0x112c   : > { %v1912_v6 = vpop.f32.mrb[40].mxu1 }
0x112d   : > { %v2477_v7 = vpop.f32.mrb[41].mxu1  ;;  %v1919_v9 = vmax.f32 %v1912_v6, 0.0 }
0x112e   : > { %v1915_v8 = vpop.f32.mrb[42].mxu1 }
0x112f   : > { %v1920_v10 = vmax.f32 %v1915_v8, 0.0  ;;  %v2478_v11 = vpop.f32.mrb[43].mxu1 }
0x1131   : > { %v1921_v12 = vpack.c.bf16 %v1920_v10, %v1919_v9 }
0x1133   : > { %2484 = vmatmul.mubr.msk.bf16.vlgmr.msra.gmra.mrb[44].mxu0 %vm592_vm1, %v1921_v12 }
0x1205   : > { %1989 = sbr.rel (%p2281_p11) target bundleno = 4948 (0x1354), region = 92 }
0x1206   : > { %v1975_v13 = vpop.f32.mrb[44].mxu0 }
0x1207   : > { %v1982_v14 = vadd.f32 %v1975_v13, %v3433_v24  ;;  %v2485_v15 = vpop.f32.mrb[45].mxu0 }
0x1208   : > { %v1978_v16 = vpop.f32.mrb[46].mxu0 }
0x1209   : > { %1984 = vst.msk [vmem:[#allocation2] sm:$0xff] %vm592_vm1, %v1982_v14  ;;  %v1983_v18 = vadd.f32 %v1978_v16, %v3436_v27  ;;  %v2486_v19 = vpop.f32.mrb[47].mxu0  ;;  %v1992_v20 = vsel (!%p2281_p11), %vm592_vm1, %v1982_v14, 0.0 }
0x120a   : > { %1993 = vadd.xlane.f32.xlu0 (!%p2281_p11), %v1992_v20 }
0x120b   : > { %1985 = vst.msk [vmem:[#allocation2 + $0x8] sm:$0xff] %vm592_vm1, %v1983_v18  ;;  %v1995_v21 = vsel (!%p2281_p11), %vm592_vm1, %v1983_v18, 0.0 }
0x120e   : > { %1996 = vadd.xlane.f32.xlu0 %v1995_v21 }
0x1297   : > { %v1994_v22 = vpop.xlane.xlu0 %1993 }
0x1298   : > { %v1998_v23 = vmul.f32 0.03125, %v1994_v22 }
0x129a   : > { %v2000_v24 = vsub.f32 %v1982_v14, %v1998_v23 }
0x129b   : > { %v1997_v25 = vpop.xlane.xlu0 %1996 }
0x129c   : > { %v1999_v26 = vmul.f32 0.03125, %v1997_v25  ;;  %v2002_v28 = vmul.f32 %v2000_v24, %v2000_v24  ;;  %v2032_v52 = vmul.f32 %v2282_v49, %v2000_v24 }
0x129e   : > { %v2001_v29 = vsub.f32 %v1983_v18, %v1999_v26  ;;  %v2004_v27 = vsel %vm592_vm1, %v2002_v28, 0.0 }
0x129f   : > { %2005 = vadd.xlane.f32.xlu1 %v2004_v27 }
0x12a0   : > { %v2003_v30 = vmul.f32 %v2001_v29, %v2001_v29  ;;  %v2033_v57 = vmul.f32 %v2282_v49, %v2001_v29 }
0x12a2   : > { %v2007_v31 = vsel %vm592_vm1, %v2003_v30, 0.0 }
0x12a3   : > { %2008 = vadd.xlane.f32.xlu1 %v2007_v31 }
0x132c   : > { %v2006_v43 = vpop.xlane.xlu1 %2005 }
0x132d   : > { %v2010_v32 = vmul.f32 0.032258064, %v2006_v43 }
0x132f   : > { %2632 = vrsqrt.f32 %v2010_v32  ;;  %vm2014_vm13 = vcmp.eq.f32.partialorder %v2010_v32, inf  ;;  %v2017_v36 = vand.u32 2147483648, %v2010_v32  ;;  %vm2016_vm14 = vcmp.eq.f32.partialorder %v2010_v32, 0.0 }
0x1330   : > { %v2009_v33 = vpop.xlane.xlu1 %2008 }
0x1331   : > { %v2011_v44 = vmul.f32 0.032258064, %v2009_v33 }
0x1333   : > { %2634 = vrsqrt.f32 %v2011_v44  ;;  %vm2021_vm15 = vcmp.eq.f32.partialorder %v2011_v44, inf  ;;  %v2024_v42 = vand.u32 2147483648, %v2011_v44  ;;  %vm2023_vm0 = vcmp.eq.f32.partialorder %v2011_v44, 0.0 }
0x1339   : > { %v2633_v34 = vpop.eup %2632 }
0x133a   : > { %v2013_v35 = vmul.f32 %v2633_v34, %v2010_v32 }
0x133c   : > { %v2015_v37 = vsel %vm2014_vm13, %v2010_v32, %v2013_v35 }
0x133d   : > { %v2635_v38 = vpop.eup %2634  ;;  %v2018_v39 = vsel %vm2016_vm14, %v2017_v36, %v2015_v37 }
0x133e   : > { %v2034_v40 = vadd.f32 1e-06, %v2018_v39  ;;  %v2020_v41 = vmul.f32 %v2635_v38, %v2011_v44 }
0x1340   : > { %2636 = vrcp.f32 %v2034_v40  ;;  %v2022_v45 = vsel %vm2021_vm15, %v2011_v44, %v2020_v41 }
0x1341   : > { %v2025_v46 = vsel %vm2023_vm0, %v2024_v42, %v2022_v45 }
0x1342   : > { %v2035_v48 = vadd.f32 1e-06, %v2025_v46 }
0x1344   : > { %2638 = vrcp.f32 %v2035_v48 }
0x134a   : > { %v2637_v53 = vpop.eup %2636 }
0x134b   : > { %v2037_v56 = vmul.f32 %v2637_v53, %v2032_v52 }
0x134d   : > { %v2046_v58 = vadd.f32 %v2283_v55, %v2037_v56 }
0x134e   : > { %v2639_v17 = vpop.eup %2638 }
0x134f   : > { %2048 = vst.msk [vmem:[#allocation12] sm:$0xff] %vm592_vm1, %v2046_v58  ;;  %v2039_v59 = vmul.f32 %v2639_v17, %v2033_v57 }
0x1351   : > { %v2047_v60 = vadd.f32 %v2283_v55, %v2039_v59 }
0x1353   : > { %2049 = vst.msk [vmem:[#allocation12 + $0x8] sm:$0xff] %vm592_vm1, %v2047_v60 }
0x1354 PF: > { %p2523_p8 = scmp.eq.s32.totalorder %s3074_s14, 1  ;;  %s2884_s3 = smov [#allocation12]  }
0x1355   : > { %s2056_s21 = sshll.u32 %s2884_s3, 4  ;;  %s2057_s21 = int_to_ptr.vmem [resolvable:$true] %s2056_s21 }
0x1356   : > { %s2788_s30 = scalar_lea.vmem %s2057_s21, 256  ;;  %p2795_p2 = scmp.lt.s32.totalorder %s2057_s21, %s2057_s21 }
0x1357   : > { %p2789_p0 = scmp.ne.s32.totalorder %s2057_s21, %s2788_s30  ;;  %p2796_p1 = scmp.lt.s32.totalorder %s2788_s30, %s2788_s30 }
0x1359   : > { %p2790_p5 = pnand %p2789_p0, %p2523_p8  ;;  %p2797_p13 = por %p2796_p1, %p2795_p2 }
0x135b   : > { %p2791_p7 = pneg %p2790_p5 }
0x135d   : > { %p2798_p12 = pnand %p2797_p13, %p2791_p7 }
0x135f   : > { %2801 = shalt.err (!%p2798_p12)
}
0x1360   : > { %s3579_s1 = sld [smem:[#allocation25_spill]] }
0x1366   : > { %s2802_s12 = scalar_lea.hbm %s3579_s1, 256 }
0x1367   : > { %p2803_p10 = scmp.ne.s32.totalorder %s3579_s1, %s2802_s12  ;;  %p2808_p3 = scmp.lt.u32.totalorder %s2802_s12, %s3579_s1 }
0x1369   : > { %p2804_p9 = pnand %p2803_p10, %p2523_p8 }
0x136b   : > { %p2805_p6 = pneg %p2804_p9 }
0x136d   : > { %p2810_p4 = pnand %p2808_p3, %p2805_p6 }
0x136f   : > { %2813 = shalt.err (!%p2810_p4)
}
0x1370   : > { %s2885_s27 = smov 128   ;;  %s2886_s19 = smov 8  }
0x1371   : > { %2500 = dma.vmem_to_hbm [thread:$0]  (%p2523_p8), %s2057_s21, 256, %s3579_s1, [#allocation5], %s2885_s27, %s2885_s27, %s2886_s19  }
0x1372   : > { %2843 = dma.done.wait (%p2523_p8), [#allocation5], 256  }
0x1373   : > { %2845 = vsyncadd (%p2523_p8), [#allocation5], 4294967040 }
0x1374 PF: > { %s3580_s20 = sld [smem:[#allocation18_spill]]  ;;  %s3581_s15 = sld [smem:[#allocation17_spill]] }
0x1375   : > { %s3582_s19 = sld [smem:[#allocation19_spill]]  ;;  %s3583_s17 = smov %s2852_s18 }
0x137a   : > { %p26_p11 = scmp.ge.s32.totalorder %s3580_s20, 4   ;;  %s3584_s18 = smov %s3581_s15 }
0x137c   :  { %28 = sbr.rel (!%p26_p11) target bundleno = 14 (0xe), region = 164 }
0x1383   :  { %2072 = vsyncpa [#allocation4], 1 }
0x1384   :  { %2074 = vsyncpa [#allocation4 + $0x1], 1 }
0x1385   :  { %2075 = vsyncpa [#allocation7], 1 }
0x1386   :  { %2077 = vsyncpa [#allocation7 + $0x1], 1 }
0x1387   :  { %2078 = vsyncpa [#allocation10], 1 }
0x1388   :  { %2080 = vsyncpa [#allocation10 + $0x1], 1 }
0x1389   :  { %2081 = vsyncpa [#allocation5], 1 }
0x138a   :  { %2083 = vsyncpa [#allocation5 + $0x1], 1 }

</bundles_post_ra>
